<compile_context>
chip_gen: v6e
topology: v6e:2x2x1
jax: 0.10.0
libtpu: 0.0.40
codegen_flags: <defaults>
</compile_context>

<pallas_src>
import functools

import jax
import jax.numpy as jnp
from jax import lax
from jax.experimental import pallas as pl
from jax.experimental.pallas import tpu as pltpu

NEG_SLOPE = 0.2     # GATConv default LeakyReLU negative_slope
NEG_INF = -1e30     # additive mask for cross-image (non-)edges


def _leaky_relu(e):
    return jnp.where(e > 0, e, NEG_SLOPE * e)


def _softmax_last(e):
    """Row softmax over the last axis; divide on the EUP via approx reciprocal."""
    e = e - jnp.max(e, axis=-1, keepdims=True)
    p = jnp.exp(e)
    return p * pl.reciprocal(jnp.sum(p, axis=-1, keepdims=True), approx=True)


def gnn_head_kernel(x_ref, w1f_ref, b1_ref, w2f_ref, b2t_ref, mask_ref, hmask_ref,
                    scores_ref, labels_ref, *, num_heads, hidden, num_classes):
    Bg, N, C_in = x_ref.shape
    H, Hid, C = num_heads, hidden, num_classes
    HH = H * Hid
    M = Bg * N                                    # flat node count handled this step

    mask = mask_ref[...]                          # (M, M): 0 within image, -1e30 across

    # ---- GATConv 1: single fused matmul (linear + both attention projections) ----
    x2 = x_ref[...].reshape(M, C_in)
    hs1 = jnp.dot(x2, w1f_ref[...], preferred_element_type=jnp.float32)   # (M, HH+2H)
    h1 = hs1[:, :HH]                                                      # (M, HH)
    s1 = hs1[:, HH:HH + H]                                                # (M, H) src scores
    d1 = hs1[:, HH + H:]                                                  # (M, H) dst scores

    # e1[m, h, m'] = d1[m, h] + s1[m', h]   (dest node m, source node m')
    d1_3 = jnp.swapaxes(d1[:, None, :], 1, 2)                             # (M, H, 1)
    s1_3 = jnp.swapaxes(s1, 0, 1)[None, :, :]                             # (1, H, M)
    e1 = d1_3 + s1_3                                                      # (M, H, M)
    a1 = _softmax_last(_leaky_relu(e1) + mask[:, None, :])                # (M, H, M)

    # one matmul for every (dest, head) row, then block-diagonal head selection
    agg = jnp.dot(a1.reshape(M * H, M), h1,
                  preferred_element_type=jnp.float32)                     # (M*H, HH)
    agg = agg.reshape(M, H, HH) * hmask_ref[...][None, :, :]              # keep own head cols
    act = jnp.maximum(jnp.sum(agg, axis=1) + b1_ref[...], 0.0)            # (M, HH)

    # ---- GATConv 2 (single head, concat=False): single fused matmul ----
    hs2 = jnp.dot(act, w2f_ref[...], preferred_element_type=jnp.float32)  # (M, C+2)
    h2 = hs2[:, :C]                                                       # (M, C)
    s2 = hs2[:, C:C + 1]                                                  # (M, 1)
    d2 = hs2[:, C + 1:C + 2]                                              # (M, 1)
    e2 = d2 + jnp.swapaxes(s2, 0, 1)                                      # (M, M)
    a2 = _softmax_last(_leaky_relu(e2) + mask)                            # (M, M)
    logits = jnp.dot(a2, h2, preferred_element_type=jnp.float32)          # (M, C)
    logits_t = jnp.swapaxes(logits, 0, 1) + b2t_ref[...]                  # (C, M) lane-dense

    # ---- det['scores'] / det['labels']: classes on sublanes, detections on lanes ----
    mx = jnp.max(logits_t, axis=0, keepdims=True)                         # (1, M)
    den = jnp.sum(jnp.exp(logits_t - mx), axis=0, keepdims=True)          # (1, M)
    scores = 1.0 / den                        # exact divide for the user-facing scores
    cls = lax.broadcasted_iota(jnp.int32, logits_t.shape, 0)
    labels = jnp.min(jnp.where(logits_t == mx, cls, jnp.int32(2 ** 30)),
                     axis=0, keepdims=True)                               # first argmax

    scores_ref[...] = scores[None]                                        # (1, 1, M)
    labels_ref[...] = labels[None]                                        # (1, 1, M)


def _pack_fused_weights(params):
    """Fold the per-head attention vectors into the main linears (one-time, host side)."""
    w1, asrc1, adst1, b1, w2, asrc2, adst2, b2 = params
    H, Hid = asrc1.shape
    HH = H * Hid
    C_out = w2.shape[1]

    eye = jnp.eye(H, dtype=w1.dtype)
    w_src = (eye[:, None, :] * asrc1[:, :, None]).reshape(HH, H)      # block-diag a_src
    w_dst = (eye[:, None, :] * adst1.T[:, :, None]).reshape(HH, H)    # block-diag a_dst
    watt1 = jnp.concatenate([w_src, w_dst], axis=1)                   # (HH, 2H)
    w1f = jnp.concatenate([w1, w1 @ watt1], axis=1)                   # (C_in, HH+2H)

    watt2 = jnp.concatenate([asrc2.T, adst2], axis=1)                 # (C_out, 2)
    w2f = jnp.concatenate([w2, w2 @ watt2], axis=1)                   # (HH, C_out+2)

    b2t = b2.reshape(C_out, 1)                                        # (C_out, 1)
    hmask = jnp.repeat(jnp.eye(H, dtype=w1.dtype), Hid, axis=1)       # (H, HH)
    return w1f, b1, w2f, b2t, hmask


def gnn_head_pallas(feats, params, grid_steps=1):
    """feats: (B, N, C_in) ROI features per image. Returns (scores, labels), each (B, N)."""
    B, N, C_in = feats.shape
    w1, asrc1, adst1, b1, w2, asrc2, adst2, b2 = params
    H, Hid = asrc1.shape
    C_out = w2.shape[1]

    G = grid_steps
    assert B % G == 0, "batch must be divisible by the number of grid steps"
    Bg = B // G
    M = Bg * N

    w1f, b1, w2f, b2t, hmask = _pack_fused_weights(params)
    # additive mask keeping the softmax per image on the flat Bg*N node axis
    img = jnp.repeat(jnp.arange(Bg, dtype=jnp.int32), N)
    mask = jnp.where(img[:, None] == img[None, :], 0.0, NEG_INF).astype(jnp.float32)

    kernel = functools.partial(gnn_head_kernel, num_heads=H, hidden=Hid,
                               num_classes=C_out)
    full = lambda a: pl.BlockSpec(a.shape, lambda g, _nd=a.ndim: (0,) * _nd)

    scores, labels = pl.pallas_call(
        kernel,
        out_shape=(jax.ShapeDtypeStruct((G, 1, M), jnp.float32),
                   jax.ShapeDtypeStruct((G, 1, M), jnp.int32)),
        grid_spec=pltpu.PrefetchScalarGridSpec(
            num_scalar_prefetch=0,
            grid=(G,),
            in_specs=[pl.BlockSpec((Bg, N, C_in), lambda g: (g, 0, 0)),
                      full(w1f), full(b1), full(w2f), full(b2t),
                      full(mask), full(hmask)],
            out_specs=[pl.BlockSpec((1, 1, M), lambda g: (g, 0, 0)),
                       pl.BlockSpec((1, 1, M), lambda g: (g, 0, 0))]),
        compiler_params=pltpu.CompilerParams(dimension_semantics=("parallel",)),
    )(feats, w1f, b1, w2f, b2t, mask, hmask)
    return scores.reshape(B, N), labels.reshape(B, N)


def gnn_head_ref(feats, params):
    """Plain-JAX reference of the same math (for validation)."""
    w1, asrc1, adst1, b1, w2, asrc2, adst2, b2 = params
    H, Hid = asrc1.shape

    def one(x):
        h1 = x @ w1
        heads = []
        for h in range(H):
            hh = h1[:, h * Hid:(h + 1) * Hid]
            s = hh @ asrc1[h]
            d = hh @ adst1[:, h]
            e = d[:, None] + s[None, :]
            e = jnp.where(e > 0, e, NEG_SLOPE * e)
            heads.append(jax.nn.softmax(e, axis=1) @ hh)
        out1 = jnp.maximum(jnp.concatenate(heads, axis=1) + b1[0], 0.0)
        h2 = out1 @ w2
        s = h2 @ asrc2[0]
        d = h2 @ adst2[:, 0]
        e = d[:, None] + s[None, :]
        e = jnp.where(e > 0, e, NEG_SLOPE * e)
        logits = jax.nn.softmax(e, axis=1) @ h2 + b2[0]
        probs = jax.nn.softmax(logits, axis=1)
        return probs.max(axis=1), jnp.argmax(logits, axis=1)

    return jax.vmap(one)(feats)


if __name__ == "__main__":
    key = jax.random.PRNGKey(0)
    B, N = 2, 8                          # images, detections (graph nodes) per image
    C_in, Hid, H, C_out = 32, 16, 4, 8   # in_features, hidden_channels, heads, num_classes

    ks = jax.random.split(key, 9)
    feats = jax.random.normal(ks[0], (B, N, C_in), jnp.float32) * 0.5   # ROI features stand-in
    w1    = jax.random.normal(ks[1], (C_in, H * Hid), jnp.float32) * 0.1
    asrc1 = jax.random.normal(ks[2], (H, Hid), jnp.float32) * 0.1
    adst1 = jax.random.normal(ks[3], (Hid, H), jnp.float32) * 0.1
    b1    = jax.random.normal(ks[4], (1, H * Hid), jnp.float32) * 0.01
    w2    = jax.random.normal(ks[5], (H * Hid, C_out), jnp.float32) * 0.1
    asrc2 = jax.random.normal(ks[6], (1, C_out), jnp.float32) * 0.1
    adst2 = jax.random.normal(ks[7], (C_out, 1), jnp.float32) * 0.1
    b2    = jax.random.normal(ks[8], (1, C_out), jnp.float32) * 0.01
    params = (w1, asrc1, adst1, b1, w2, asrc2, adst2, b2)

    scores, labels = gnn_head_pallas(feats, params)
    jax.block_until_ready((scores, labels))

    ref_scores, ref_labels = gnn_head_ref(feats, params)
    assert scores.shape == (B, N) and labels.shape == (B, N)
    assert labels.dtype == jnp.int32
    assert jnp.allclose(scores, ref_scores, atol=5e-2, rtol=5e-2)
    assert jnp.array_equal(labels, ref_labels.astype(jnp.int32))

    print("KERNEL_OK")
</pallas_src>

<mosaic_0001>
module attributes {stable_mosaic.version = 11 : i64} {
  func.func @gnn_head_kernel(%arg0: i32, %arg1: memref<2x8x32xf32, #tpu.memory_space<vmem>>, %arg2: memref<32x72xf32, #tpu.memory_space<vmem>>, %arg3: memref<1x64xf32, #tpu.memory_space<vmem>>, %arg4: memref<64x10xf32, #tpu.memory_space<vmem>>, %arg5: memref<8x1xf32, #tpu.memory_space<vmem>>, %arg6: memref<16x16xf32, #tpu.memory_space<vmem>>, %arg7: memref<4x64xf32, #tpu.memory_space<vmem>>, %arg8: memref<1x1x16xf32, #tpu.memory_space<vmem>>, %arg9: memref<1x1x16xi32, #tpu.memory_space<vmem>>) attributes {dimension_semantics = [#tpu.dimension_semantics<parallel>], iteration_bounds = array<i64: 1>, scalar_prefetch = 0 : i64, scratch_operands = 0 : i64, tpu.core_type = #tpu.core_type<tc>, window_params = [{transform_indices = @transform_0, window_bounds = array<i64: 2, 8, 32>}, {pipeline_mode = #tpu.pipeline_mode<synchronous>, transform_indices = @transform_1, window_bounds = array<i64: 32, 72>}, {pipeline_mode = #tpu.pipeline_mode<synchronous>, transform_indices = @transform_2, window_bounds = array<i64: 1, 64>}, {pipeline_mode = #tpu.pipeline_mode<synchronous>, transform_indices = @transform_3, window_bounds = array<i64: 64, 10>}, {pipeline_mode = #tpu.pipeline_mode<synchronous>, transform_indices = @transform_4, window_bounds = array<i64: 8, 1>}, {pipeline_mode = #tpu.pipeline_mode<synchronous>, transform_indices = @transform_5, window_bounds = array<i64: 16, 16>}, {pipeline_mode = #tpu.pipeline_mode<synchronous>, transform_indices = @transform_6, window_bounds = array<i64: 4, 64>}, {transform_indices = @transform_7, window_bounds = array<i64: 1, 1, 16>}, {transform_indices = @transform_8, window_bounds = array<i64: 1, 1, 16>}]} {
    %c0 = arith.constant 0 : index
    %c0_0 = arith.constant 0 : index
    %0 = vector.load %arg6[%c0, %c0_0] : memref<16x16xf32, #tpu.memory_space<vmem>>, vector<16x16xf32>
    %c0_1 = arith.constant 0 : index
    %c0_2 = arith.constant 0 : index
    %c0_3 = arith.constant 0 : index
    %1 = vector.load %arg1[%c0_1, %c0_2, %c0_3] : memref<2x8x32xf32, #tpu.memory_space<vmem>>, vector<2x8x32xf32>
    %2 = vector.shape_cast %1 : vector<2x8x32xf32> to vector<16x32xf32>
    %c0_4 = arith.constant 0 : index
    %c0_5 = arith.constant 0 : index
    %3 = vector.load %arg2[%c0_4, %c0_5] : memref<32x72xf32, #tpu.memory_space<vmem>>, vector<32x72xf32>
    %cst = arith.constant dense<0.000000e+00> : vector<16x72xf32>
    %4 = tpu.matmul %2, %3, %cst {dimension_numbers = #tpu.dot_dimension_numbers<[1], [0], [0], [1], [0, 0, 1, 1], [], []>} : vector<16x32xf32>, vector<32x72xf32>, vector<16x72xf32> -> vector<16x72xf32>
    %5 = vector.extract_strided_slice %4 {offsets = [0, 0], sizes = [16, 64], strides = [1, 1]} : vector<16x72xf32> to vector<16x64xf32>
    %6 = vector.extract_strided_slice %4 {offsets = [0, 64], sizes = [16, 4], strides = [1, 1]} : vector<16x72xf32> to vector<16x4xf32>
    %7 = vector.extract_strided_slice %4 {offsets = [0, 68], sizes = [16, 4], strides = [1, 1]} : vector<16x72xf32> to vector<16x4xf32>
    %8 = vector.shape_cast %7 : vector<16x4xf32> to vector<16x1x4xf32>
    %9 = tpu.transpose %8, [0, 2, 1] : vector<16x1x4xf32> -> vector<16x4x1xf32>
    %10 = tpu.transpose %6, [1, 0] : vector<16x4xf32> -> vector<4x16xf32>
    %11 = vector.shape_cast %10 : vector<4x16xf32> to vector<1x4x16xf32>
    %12 = vector.broadcast %9 : vector<16x4x1xf32> to vector<16x4x16xf32>
    %13 = vector.broadcast %11 : vector<1x4x16xf32> to vector<16x4x16xf32>
    %14 = arith.addf %12, %13 : vector<16x4x16xf32>
    %cst_6 = arith.constant 0.000000e+00 : f32
    %15 = vector.broadcast %cst_6 : f32 to vector<16x4x16xf32>
    %16 = arith.cmpf ogt, %14, %15 : vector<16x4x16xf32>
    %cst_7 = arith.constant 2.000000e-01 : f32
    %17 = vector.broadcast %cst_7 : f32 to vector<16x4x16xf32>
    %18 = arith.mulf %17, %14 : vector<16x4x16xf32>
    %19 = arith.select %16, %14, %18 : vector<16x4x16xi1>, vector<16x4x16xf32>
    %20 = vector.shape_cast %0 : vector<16x16xf32> to vector<16x1x16xf32>
    %21 = vector.broadcast %20 : vector<16x1x16xf32> to vector<16x4x16xf32>
    %22 = arith.addf %19, %21 : vector<16x4x16xf32>
    %cst_8 = arith.constant dense<0xFF800000> : vector<16x4xf32>
    %23 = vector.multi_reduction <maximumf>, %22, %cst_8 [2] : vector<16x4x16xf32> to vector<16x4xf32>
    %24 = vector.shape_cast %23 : vector<16x4xf32> to vector<16x4x1xf32>
    %25 = vector.broadcast %24 : vector<16x4x1xf32> to vector<16x4x16xf32>
    %26 = arith.subf %22, %25 : vector<16x4x16xf32>
    %27 = math.exp %26 : vector<16x4x16xf32>
    %cst_9 = arith.constant dense<0.000000e+00> : vector<16x4xf32>
    %28 = vector.multi_reduction <add>, %27, %cst_9 [2] : vector<16x4x16xf32> to vector<16x4xf32>
    %29 = vector.shape_cast %28 : vector<16x4xf32> to vector<16x4x1xf32>
    %30 = tpu.reciprocal %29 {approx = true} : vector<16x4x1xf32> -> vector<16x4x1xf32>
    %31 = vector.broadcast %30 : vector<16x4x1xf32> to vector<16x4x16xf32>
    %32 = arith.mulf %27, %31 : vector<16x4x16xf32>
    %33 = vector.shape_cast %32 : vector<16x4x16xf32> to vector<64x16xf32>
    %cst_10 = arith.constant dense<0.000000e+00> : vector<64x64xf32>
    %34 = tpu.matmul %33, %5, %cst_10 {dimension_numbers = #tpu.dot_dimension_numbers<[1], [0], [0], [1], [0, 0, 1, 1], [], []>} : vector<64x16xf32>, vector<16x64xf32>, vector<64x64xf32> -> vector<64x64xf32>
    %35 = vector.shape_cast %34 : vector<64x64xf32> to vector<16x4x64xf32>
    %c0_11 = arith.constant 0 : index
    %c0_12 = arith.constant 0 : index
    %36 = vector.load %arg7[%c0_11, %c0_12] : memref<4x64xf32, #tpu.memory_space<vmem>>, vector<4x64xf32>
    %37 = vector.shape_cast %36 : vector<4x64xf32> to vector<1x4x64xf32>
    %38 = vector.broadcast %37 : vector<1x4x64xf32> to vector<16x4x64xf32>
    %39 = arith.mulf %35, %38 : vector<16x4x64xf32>
    %cst_13 = arith.constant dense<0.000000e+00> : vector<16x64xf32>
    %40 = vector.multi_reduction <add>, %39, %cst_13 [1] : vector<16x4x64xf32> to vector<16x64xf32>
    %c0_14 = arith.constant 0 : index
    %c0_15 = arith.constant 0 : index
    %41 = vector.load %arg3[%c0_14, %c0_15] : memref<1x64xf32, #tpu.memory_space<vmem>>, vector<1x64xf32>
    %42 = vector.broadcast %41 : vector<1x64xf32> to vector<16x64xf32>
    %43 = arith.addf %40, %42 : vector<16x64xf32>
    %cst_16 = arith.constant 0.000000e+00 : f32
    %44 = vector.broadcast %cst_16 : f32 to vector<16x64xf32>
    %45 = arith.maximumf %43, %44 : vector<16x64xf32>
    %c0_17 = arith.constant 0 : index
    %c0_18 = arith.constant 0 : index
    %46 = vector.load %arg4[%c0_17, %c0_18] : memref<64x10xf32, #tpu.memory_space<vmem>>, vector<64x10xf32>
    %cst_19 = arith.constant dense<0.000000e+00> : vector<16x10xf32>
    %47 = tpu.matmul %45, %46, %cst_19 {dimension_numbers = #tpu.dot_dimension_numbers<[1], [0], [0], [1], [0, 0, 1, 1], [], []>} : vector<16x64xf32>, vector<64x10xf32>, vector<16x10xf32> -> vector<16x10xf32>
    %48 = vector.extract_strided_slice %47 {offsets = [0, 0], sizes = [16, 8], strides = [1, 1]} : vector<16x10xf32> to vector<16x8xf32>
    %49 = vector.extract_strided_slice %47 {offsets = [0, 8], sizes = [16, 1], strides = [1, 1]} : vector<16x10xf32> to vector<16x1xf32>
    %50 = vector.extract_strided_slice %47 {offsets = [0, 9], sizes = [16, 1], strides = [1, 1]} : vector<16x10xf32> to vector<16x1xf32>
    %51 = tpu.transpose %49, [1, 0] : vector<16x1xf32> -> vector<1x16xf32>
    %52 = vector.broadcast %50 : vector<16x1xf32> to vector<16x16xf32>
    %53 = vector.broadcast %51 : vector<1x16xf32> to vector<16x16xf32>
    %54 = arith.addf %52, %53 : vector<16x16xf32>
    %cst_20 = arith.constant 0.000000e+00 : f32
    %55 = vector.broadcast %cst_20 : f32 to vector<16x16xf32>
    %56 = arith.cmpf ogt, %54, %55 : vector<16x16xf32>
    %cst_21 = arith.constant 2.000000e-01 : f32
    %57 = vector.broadcast %cst_21 : f32 to vector<16x16xf32>
    %58 = arith.mulf %57, %54 : vector<16x16xf32>
    %59 = arith.select %56, %54, %58 : vector<16x16xi1>, vector<16x16xf32>
    %60 = arith.addf %59, %0 : vector<16x16xf32>
    %cst_22 = arith.constant dense<0xFF800000> : vector<16xf32>
    %61 = vector.multi_reduction <maximumf>, %60, %cst_22 [1] : vector<16x16xf32> to vector<16xf32>
    %62 = vector.shape_cast %61 : vector<16xf32> to vector<16x1xf32>
    %63 = vector.broadcast %62 : vector<16x1xf32> to vector<16x16xf32>
    %64 = arith.subf %60, %63 : vector<16x16xf32>
    %65 = math.exp %64 : vector<16x16xf32>
    %cst_23 = arith.constant dense<0.000000e+00> : vector<16xf32>
    %66 = vector.multi_reduction <add>, %65, %cst_23 [1] : vector<16x16xf32> to vector<16xf32>
    %67 = vector.shape_cast %66 : vector<16xf32> to vector<16x1xf32>
    %68 = tpu.reciprocal %67 {approx = true} : vector<16x1xf32> -> vector<16x1xf32>
    %69 = vector.broadcast %68 : vector<16x1xf32> to vector<16x16xf32>
    %70 = arith.mulf %65, %69 : vector<16x16xf32>
    %cst_24 = arith.constant dense<0.000000e+00> : vector<16x8xf32>
    %71 = tpu.matmul %70, %48, %cst_24 {dimension_numbers = #tpu.dot_dimension_numbers<[1], [0], [0], [1], [0, 0, 1, 1], [], []>} : vector<16x16xf32>, vector<16x8xf32>, vector<16x8xf32> -> vector<16x8xf32>
    %72 = tpu.transpose %71, [1, 0] : vector<16x8xf32> -> vector<8x16xf32>
    %c0_25 = arith.constant 0 : index
    %c0_26 = arith.constant 0 : index
    %73 = vector.load %arg5[%c0_25, %c0_26] : memref<8x1xf32, #tpu.memory_space<vmem>>, vector<8x1xf32>
    %74 = vector.broadcast %73 : vector<8x1xf32> to vector<8x16xf32>
    %75 = arith.addf %72, %74 : vector<8x16xf32>
    %cst_27 = arith.constant dense<0xFF800000> : vector<16xf32>
    %76 = vector.multi_reduction <maximumf>, %75, %cst_27 [0] : vector<8x16xf32> to vector<16xf32>
    %77 = vector.shape_cast %76 : vector<16xf32> to vector<1x16xf32>
    %78 = vector.broadcast %77 : vector<1x16xf32> to vector<8x16xf32>
    %79 = arith.subf %75, %78 : vector<8x16xf32>
    %80 = math.exp %79 : vector<8x16xf32>
    %cst_28 = arith.constant dense<0.000000e+00> : vector<16xf32>
    %81 = vector.multi_reduction <add>, %80, %cst_28 [0] : vector<8x16xf32> to vector<16xf32>
    %82 = vector.shape_cast %81 : vector<16xf32> to vector<1x16xf32>
    %cst_29 = arith.constant 1.000000e+00 : f32
    %83 = vector.broadcast %cst_29 : f32 to vector<1x16xf32>
    %84 = arith.divf %83, %82 : vector<1x16xf32>
    %85 = tpu.iota {dimensions = array<i32: 0>} : vector<8x16xi32>
    %86 = vector.broadcast %77 : vector<1x16xf32> to vector<8x16xf32>
    %87 = arith.cmpf oeq, %75, %86 : vector<8x16xf32>
    %c1073741824_i32 = arith.constant 1073741824 : i32
    %88 = vector.broadcast %c1073741824_i32 : i32 to vector<8x16xi32>
    %89 = arith.select %87, %85, %88 : vector<8x16xi1>, vector<8x16xi32>
    %cst_30 = arith.constant dense<2147483647> : vector<16xi32>
    %90 = vector.multi_reduction <minsi>, %89, %cst_30 [0] : vector<8x16xi32> to vector<16xi32>
    %91 = vector.shape_cast %90 : vector<16xi32> to vector<1x16xi32>
    %92 = vector.shape_cast %84 : vector<1x16xf32> to vector<1x1x16xf32>
    %c0_31 = arith.constant 0 : index
    %c0_32 = arith.constant 0 : index
    %c0_33 = arith.constant 0 : index
    %93 = vector.load %arg8[%c0_31, %c0_32, %c0_33] : memref<1x1x16xf32, #tpu.memory_space<vmem>>, vector<1x1x16xf32>
    tpu.vector_store %arg8[%c0_31, %c0_32, %c0_33], %92 {strides = array<i32>} : memref<1x1x16xf32, #tpu.memory_space<vmem>>, vector<1x1x16xf32>,
    %94 = vector.shape_cast %91 : vector<1x16xi32> to vector<1x1x16xi32>
    %c0_34 = arith.constant 0 : index
    %c0_35 = arith.constant 0 : index
    %c0_36 = arith.constant 0 : index
    %95 = vector.load %arg9[%c0_34, %c0_35, %c0_36] : memref<1x1x16xi32, #tpu.memory_space<vmem>>, vector<1x1x16xi32>
    tpu.vector_store %arg9[%c0_34, %c0_35, %c0_36], %94 {strides = array<i32>} : memref<1x1x16xi32, #tpu.memory_space<vmem>>, vector<1x1x16xi32>,
    return
  }
  func.func @transform_0(%arg0: i32) -> (i32, i32, i32) {
    %c0_i32 = arith.constant 0 : i32
    %c0_i32_0 = arith.constant 0 : i32
    %c0_i32_1 = arith.constant 0 : i32
    return %arg0, %c0_i32, %c0_i32_0 : i32, i32, i32
  }
  func.func @transform_1(%arg0: i32) -> (i32, i32) {
    %c0_i32 = arith.constant 0 : i32
    %c0_i32_0 = arith.constant 0 : i32
    %c0_i32_1 = arith.constant 0 : i32
    return %c0_i32, %c0_i32_0 : i32, i32
  }
  func.func @transform_2(%arg0: i32) -> (i32, i32) {
    %c0_i32 = arith.constant 0 : i32
    %c0_i32_0 = arith.constant 0 : i32
    %c0_i32_1 = arith.constant 0 : i32
    return %c0_i32, %c0_i32_0 : i32, i32
  }
  func.func @transform_3(%arg0: i32) -> (i32, i32) {
    %c0_i32 = arith.constant 0 : i32
    %c0_i32_0 = arith.constant 0 : i32
    %c0_i32_1 = arith.constant 0 : i32
    return %c0_i32, %c0_i32_0 : i32, i32
  }
  func.func @transform_4(%arg0: i32) -> (i32, i32) {
    %c0_i32 = arith.constant 0 : i32
    %c0_i32_0 = arith.constant 0 : i32
    %c0_i32_1 = arith.constant 0 : i32
    return %c0_i32, %c0_i32_0 : i32, i32
  }
  func.func @transform_5(%arg0: i32) -> (i32, i32) {
    %c0_i32 = arith.constant 0 : i32
    %c0_i32_0 = arith.constant 0 : i32
    %c0_i32_1 = arith.constant 0 : i32
    return %c0_i32, %c0_i32_0 : i32, i32
  }
  func.func @transform_6(%arg0: i32) -> (i32, i32) {
    %c0_i32 = arith.constant 0 : i32
    %c0_i32_0 = arith.constant 0 : i32
    %c0_i32_1 = arith.constant 0 : i32
    return %c0_i32, %c0_i32_0 : i32, i32
  }
  func.func @transform_7(%arg0: i32) -> (i32, i32, i32) {
    %c0_i32 = arith.constant 0 : i32
    %c0_i32_0 = arith.constant 0 : i32
    %c0_i32_1 = arith.constant 0 : i32
    return %arg0, %c0_i32, %c0_i32_0 : i32, i32, i32
  }
  func.func @transform_8(%arg0: i32) -> (i32, i32, i32) {
    %c0_i32 = arith.constant 0 : i32
    %c0_i32_0 = arith.constant 0 : i32
    %c0_i32_1 = arith.constant 0 : i32
    return %arg0, %c0_i32, %c0_i32_0 : i32, i32, i32
  }
}

</mosaic_0001>

<bundles_post_ra>
// kernel: tpu_custom_call.1
= control target key start
LH: loop header
LB: loop body
LE: loop exit
PB: predicated region body
PF: predicated region fallthrough
CT: control target
= control target key end

     0   :  { %14 = vsyncpa [#allocation3], 0  ;;  %vm38_vm0 = vcmask 261120   ;;  %s2929_s0 = inlined_call_operand.vmem [shape: f32[2,8,32], index: 0, kind: input, shape index: {}]   ;;  %s2930_s1 = inlined_call_operand.vmem [shape: f32[32,72], index: 1, kind: input, shape index: {}]   ;;  %s2931_s2 = inlined_call_operand.vmem [shape: f32[1,64], index: 2, kind: input, shape index: {}]   ;;  %s2932_s3 = inlined_call_operand.vmem [shape: f32[64,10], index: 3, kind: input, shape index: {}]   ;;  %s2933_s4 = inlined_call_operand.vmem [shape: f32[8,1], index: 4, kind: input, shape index: {}]   ;;  %s2934_s5 = inlined_call_operand.vmem [shape: f32[16,16], index: 5, kind: input, shape index: {}]   ;;  %s2935_s6 = inlined_call_operand.vmem [shape: f32[4,64], index: 6, kind: input, shape index: {}]   ;;  %s2936_s7 = inlined_call_operand.hbm [shape: f32[1,1,16], index: 7, kind: output, shape index: {0}]   ;;  %s2937_s8 = inlined_call_operand.hbm [shape: s32[1,1,16], index: 8, kind: output, shape index: {1}]  }
   0x1   :  { %v37_v0 = vld [vmem:[%s2930_s1 + $0x18] sm:$0xff]  ;;  %v36_v1 = vld [vmem:[%s2930_s1 + $0x10] sm:$0xff]  ;;  %v32_v2 = vld [vmem:[%s2929_s0] sm:$0xff] }
   0x2   :  { %2190 = vmatprep.subr.mxu0 %v37_v0  ;;  %v35_v3 = vld [vmem:[%s2930_s1 + $0x8] sm:$0xff]  ;;  %2198 = vmatprep.mubr.msk.f32.mxu0 %vm38_vm0, %v32_v2 }
   0x3   :  { %2191 = vmatpush3.msra.mxu0 %v37_v0 }
   0x4   :  { %15 = vsyncpa [#allocation5], 0  ;;  %2192 = vmatprep.subr.mxu0 %v36_v1  ;;  %v34_v4 = vld [vmem:[%s2930_s1] sm:$0xff]  ;;  %v33_v5 = vld [vmem:[%s2929_s0 + $0x8] sm:$0xff]  ;;  %v2380_v6 = vmov 1966171168   ;;  %v126_v8 = vlaneseq }
   0x5   :  { %2193 = vmatpush3.msra.mxu0 %v36_v1  ;;  %v124_v7 = vunpack.c.l.s4 %v2380_v6  ;;  %s2381_s1 = smov 64   ;;  %s2382_s0 = smov 60   ;;  %vm1222_vm1 = vcmask 125952  }
   0x6   :  { %2194 = vmatprep.subr.mxu0 %v35_v3  ;;  %v2451_v10 = vshrl.u32 %v126_v8, 7 }
   0x7   :  { %2195 = vmatpush3.msra.mxu0 %v35_v3  ;;  %v125_v9 = vunpack.c.0.s8 %v124_v7 }
   0x8   :  { %2196 = vmatprep.subr.mxu0 %v34_v4  ;;  %v2458_v14 = vsub.s32 0, %v2451_v10 }
   0x9   :  { %2197 = vmatpush3.msra.mxu0 %v34_v4  ;;  %v2454_v11 = vsub.s32 %v125_v9, %v2451_v10 }
   0xa   :  { %2199 = vmatmul.mubr.msk.f32.vlgmr.msra.gmra.mxu0 %vm38_vm0, %v33_v5 }
  0xca   :  { %v2200_v12 = vpop.f32.mrf.mxu0 }
  0xcb   :  { %846 = vrot.lane.b32.xlu1 %v2200_v12, %s2381_s1  ;;  %2201 = vmatprep.subr.mxu1 %v2200_v12  ;;  %v178_v13 = vrot.slane %v2200_v12, %v2454_v11  ;;  %v171_v16 = vcombine.high %v2200_v12, %v2200_v12 }
  0xcc   :  { %v111_v15 = vpop.f32.mrf.mxu0  ;;  %2202 = vmatpush3.msra.mxu1 %v2200_v12 }
  0xcd   :  { %844 = vrot.lane.b32.xlu0 %v111_v15, %s2381_s1  ;;  %2203 = vmatprep.subr.mxu1 %v111_v15  ;;  %v194_v17 = vrot.slane %v178_v13, %v2454_v11  ;;  %v186_v18 = vcombine.high %v178_v13, %v178_v13  ;;  %v129_v19 = vrot.slane %v111_v15, %v2454_v11  ;;  %v2383_v13 = vmov 0  }
  0xce   :  { %2204 = vmatpush3.msra.mxu1 %v111_v15  ;;  %v185_v24 = vrot.slane %v171_v16, %v2454_v11  ;;  %v122_v28 = vcombine.high %v111_v15, %v111_v15 }
  0xcf   :  { %v255_v20 = vrot.slane %v194_v17, %v2458_v14  ;;  %v208_v21 = vrot.slane %v186_v18, %v2454_v11  ;;  %v145_v22 = vrot.slane %v129_v19, %v2454_v11  ;;  %v216_v27 = vcombine.high %v194_v17, %v194_v17 }
  0xd0   :  { %v187_v31 = vcombine.high %v185_v24, %v185_v24  ;;  %v137_v32 = vcombine.high %v129_v19, %v129_v19  ;;  %v201_v34 = vrot.slane %v185_v24, %v2454_v11  ;;  %v136_v38 = vrot.slane %v122_v28, %v2454_v11 }
  0xd1   :  { %300 = vrot.lane.b32.xlu0 %v255_v20, %s2382_s0  ;;  %v259_v23 = vrot.slane %v208_v21, %v2458_v14  ;;  %v167_v25 = vcombine.high %v145_v22, %v145_v22  ;;  %v223_v26 = vrot.slane %v145_v22, %v2458_v14  ;;  %v218_v30 = vcombine.high %v208_v21, %v208_v21 }
  0xd2   :  { %v263_v33 = vrot.slane %v216_v27, %v2458_v14  ;;  %v215_v36 = vrot.slane %v187_v31, %v2454_v11  ;;  %v159_v37 = vrot.slane %v137_v32, %v2454_v11  ;;  %v271_v39 = vrot.slane %v201_v34, %v2458_v14 }
  0xd3   :  { %302 = vrot.lane.b32.xlu1 %v259_v23, %s2382_s0  ;;  %v231_v29 = vrot.slane %v167_v25, %v2458_v14  ;;  %v267_v35 = vrot.slane %v218_v30, %v2458_v14  ;;  %v138_v42 = vcombine.high %v136_v38, %v136_v38  ;;  %v152_v44 = vrot.slane %v136_v38, %v2454_v11 }
  0xd4   :  { %v275_v40 = vrot.slane %v215_v36, %v2458_v14  ;;  %v169_v41 = vcombine.high %v159_v37, %v159_v37  ;;  %v227_v43 = vrot.slane %v159_v37, %v2458_v14  ;;  %v217_v48 = vcombine.high %v201_v34, %v201_v34 }
  0xd5   :  { %284 = vrot.lane.b32.xlu0 %v223_v26, %s2382_s0  ;;  %v166_v46 = vrot.slane %v138_v42, %v2454_v11  ;;  %v239_v47 = vrot.slane %v152_v44, %v2458_v14  ;;  %v219_v50 = vcombine.high %v215_v36, %v215_v36  ;;  %v168_v52 = vcombine.high %v152_v44, %v152_v44 }
  0xd6   :  { %v235_v45 = vrot.slane %v169_v41, %v2458_v14  ;;  %v279_v51 = vrot.slane %v217_v48, %v2458_v14 }
  0xd7   :  { %288 = vrot.lane.b32.xlu1 %v231_v29, %s2382_s0  ;;  %v243_v49 = vrot.slane %v166_v46, %v2458_v14  ;;  %v283_v53 = vrot.slane %v219_v50, %v2458_v14  ;;  %v170_v54 = vcombine.high %v166_v46, %v166_v46  ;;  %v247_v55 = vrot.slane %v168_v52, %v2458_v14  ;;  %v2534_v46 = vld [vmem:[%s2934_s5] sm:$0xff] }
  0xd8   :  { %v1035_v48 = vrot.slane %v2534_v46, %v2454_v11 }
  0xd9   :  { %304 = vrot.lane.b32.xlu0 %v263_v33, %s2382_s0  ;;  %v251_v56 = vrot.slane %v170_v54, %v2458_v14 }
  0xda   :  { %v1043_v52 = vcombine.high %v1035_v48, %v1035_v48 }
  0xdb   :  { %306 = vrot.lane.b32.xlu1 %v267_v35, %s2382_s0 }
  0xdd   :  { %308 = vrot.lane.b32.xlu0 %v271_v39, %s2382_s0  ;;  %v31_v39 = vld [vmem:[%s2934_s5 + $0x8] sm:$0xff] }
  0xde   :  { %v1077_v42 = vcombine.high %v31_v39, %v31_v39 }
  0xdf   :  { %310 = vrot.lane.b32.xlu1 %v275_v40, %s2382_s0 }
  0xe1   :  { %286 = vrot.lane.b32.xlu0 %v227_v43, %s2382_s0 }
  0xe3   :  { %290 = vrot.lane.b32.xlu1 %v235_v45, %s2382_s0  ;;  %v2529_v45 = vrot.slane %v1077_v42, %v2454_v11 }
  0xe5   :  { %292 = vrot.lane.b32.xlu0 %v239_v47, %s2382_s0  ;;  %v1093_v50 = vcombine.high %v2529_v45, %v2529_v45 }
  0xe7   :  { %294 = vrot.lane.b32.xlu1 %v243_v49, %s2382_s0  ;;  %v1084_v49 = vrot.slane %v31_v39, %v2454_v11 }
  0xe9   :  { %312 = vrot.lane.b32.xlu0 %v279_v51, %s2382_s0 }
  0xeb   :  { %314 = vrot.lane.b32.xlu1 %v283_v53, %s2382_s0  ;;  %v1092_v53 = vcombine.high %v1084_v49, %v1084_v49 }
  0xed   :  { %296 = vrot.lane.b32.xlu0 %v247_v55, %s2382_s0  ;;  %v1121_v55 = vrot.slane %v1093_v50, %v2454_v11 }
  0xef   :  { %298 = vrot.lane.b32.xlu1 %v251_v56, %s2382_s0  ;;  %v2547_v56 = vrot.slane %v1035_v48, %v2454_v11  ;;  %v1028_v48 = vcombine.high %v2534_v46, %v2534_v46 }
  0xf1   :  { %v1073_v42 = vcombine.high %v2547_v56, %v2547_v56 }
 0x13d   :  { %v2505_v58 = vpop.permute.xlu1 %846 }
 0x13f   :  { %v2503_v57 = vpop.permute.xlu0 %844 }
 0x143   :  { %v301_v59 = vpop.permute.xlu0 %300 }
 0x144   :  { %588 = vxpose.xlu0.b32.start.end [1/1] (short) (narrow) %v301_v59, 8  ;;  %v1100_v59 = vrot.slane %v1084_v49, %v2454_v11 }
 0x145   :  { %v303_v60 = vpop.permute.xlu1 %302 }
 0x146   :  { %620 = vxpose.xlu1.b32.start.end [1/1] (short) (narrow) %v303_v60, 8  ;;  %v1129_v60 = vrot.slane %v2547_v56, %v2458_v14 }
 0x147   :  { %v285_v61 = vpop.permute.xlu0 %284 }
 0x148   :  { %332 = vxpose.xlu0.b32.start.end [1/1] (short) (narrow) %v285_v61, 8  ;;  %v2556_v61 = vrot.slane %v1092_v53, %v2454_v11 }
 0x149   :  { %v289_v62 = vpop.permute.xlu1 %288 }
 0x14b   :  { %v305_v63 = vpop.permute.xlu0 %304 }
 0x14c   :  { %652 = vxpose.xlu0.b32.start.end [1/1] (short) (narrow) %v305_v63, 8 }
 0x14d   :  { %v307_v0 = vpop.permute.xlu1 %306 }
 0x14f   :  { %v309_v1 = vpop.permute.xlu0 %308 }
 0x150   :  { %716 = vxpose.xlu0.b32.start.end [1/1] (short) (narrow) %v309_v1, 8  ;;  %v1125_v1 = vcombine.high %v1121_v55, %v1121_v55 }
 0x151   :  { %v311_v2 = vpop.permute.xlu1 %310 }
 0x153   :  { %v287_v3 = vpop.permute.xlu0 %286 }
 0x154   :  { %396 = vxpose.xlu0.b32.start.end [1/1] (short) (narrow) %v289_v62, 8  ;;  %364 = vxpose.xlu1.b32.start.end [1/1] (short) (narrow) %v287_v3, 8 }
 0x155   :  { %v291_v4 = vpop.permute.xlu1 %290 }
 0x157   :  { %v293_v5 = vpop.permute.xlu0 %292 }
 0x158   :  { %684 = vxpose.xlu0.b32.start.end [1/1] (short) (narrow) %v307_v0, 8  ;;  %460 = vxpose.xlu1.b32.start.end [1/1] (short) (narrow) %v293_v5, 8  ;;  %v1161_v0 = vrot.slane %v1100_v59, %v2458_v14 }
 0x159   :  { %v295_v6 = vpop.permute.xlu1 %294 }
 0x15b   :  { %v313_v7 = vpop.permute.xlu0 %312 }
 0x15c   :  { %748 = vxpose.xlu0.b32.start.end [1/1] (short) (narrow) %v311_v2, 8  ;;  %492 = vxpose.xlu1.b32.start.end [1/1] (short) (narrow) %v295_v6, 8 }
 0x15d   :  { %v315_v9 = vpop.permute.xlu1 %314 }
 0x15f   :  { %v297_v8 = vpop.permute.xlu0 %296 }
 0x160   :  { %780 = vxpose.xlu0.b32.start.end [1/1] (short) (narrow) %v313_v7, 8  ;;  %524 = vxpose.xlu1.b32.start.end [1/1] (short) (narrow) %v297_v8, 8  ;;  %v1181_v7 = vrot.slane %v1121_v55, %v2458_v14 }
 0x161   :  { %v299_v12 = vpop.permute.xlu1 %298 }
 0x164   :  { %428 = vxpose.xlu0.b32.start.end [1/1] (short) (narrow) %v291_v4, 8  ;;  %812 = vxpose.xlu1.b32.start.end [1/1] (short) (narrow) %v315_v9, 8 }
 0x168   :  { %556 = vxpose.xlu1.b32.start.end [1/1] (short) (narrow) %v299_v12, 8 }
 0x186   :  { %2253 = vset.pattern.permute.xlu1 %v2383_v13 }
 0x18d   :  { %2252 = vset.pattern.permute.xlu0 %v2383_v13 }
 0x1c0   :  { %v604_v15 = vpop.trf.xlu0 }
 0x1c1   :  { %924 = vperm.xlu0 %2252, %v604_v15  }
 0x1c2   :  { %v636_v16 = vpop.trf.xlu1 }
 0x1c3   :  { %929 = vperm.xlu1 %2253, %v636_v16  }
 0x1c4   :  { %v348_v17 = vpop.trf.xlu0 }
 0x1c5   :  { %884 = vperm.xlu0 %2252, %v348_v17  }
 0x1c8   :  { %v668_v18 = vpop.trf.xlu0 }
 0x1c9   :  { %934 = vperm.xlu0 %2252, %v668_v18  }
 0x1cc   :  { %v732_v19 = vpop.trf.xlu0 }
 0x1cd   :  { %944 = vperm.xlu0 %2252, %v732_v19  }
 0x1d0   :  { %v412_v20 = vpop.trf.xlu0  ;;  %v380_v21 = vpop.trf.xlu1 }
 0x1d1   :  { %889 = vperm.xlu1 %2253, %v380_v21  }
 0x1d4   :  { %v700_v22 = vpop.trf.xlu0  ;;  %v476_v23 = vpop.trf.xlu1 }
 0x1d5   :  { %894 = vperm.xlu1 %2253, %v412_v20   ;;  %904 = vperm.xlu0 %2252, %v476_v23  }
 0x1d8   :  { %v764_v24 = vpop.trf.xlu0  ;;  %v508_v25 = vpop.trf.xlu1 }
 0x1d9   :  { %939 = vperm.xlu1 %2253, %v700_v22  }
 0x1dc   :  { %v796_v26 = vpop.trf.xlu0  ;;  %v540_v27 = vpop.trf.xlu1 }
 0x1dd   :  { %914 = vperm.xlu0 %2252, %v540_v27   ;;  %v1189_v27 = vrot.slane %v1125_v1, %v2458_v14 }
 0x1e0   :  { %v444_v28 = vpop.trf.xlu0  ;;  %v828_v29 = vpop.trf.xlu1 }
 0x1e1   :  { %899 = vperm.xlu1 %2253, %v444_v28   ;;  %954 = vperm.xlu0 %2252, %v796_v26   ;;  %v1165_v26 = vrot.slane %v2556_v61, %v2458_v14 }
 0x1e4   :  { %v572_v30 = vpop.trf.xlu1 }
 0x1e5   :  { %909 = vperm.xlu1 %2253, %v508_v25  }
 0x1e9   :  { %919 = vperm.xlu1 %2253, %v572_v30   ;;  %v1122_v30 = vcombine.high %v1100_v59, %v1100_v59  ;;  %v1137_v59 = vrot.slane %v1073_v42, %v2458_v14 }
 0x1ed   :  { %949 = vperm.xlu1 %2253, %v764_v24  }
 0x1f1   :  { %959 = vperm.xlu1 %2253, %v828_v29  }
 0x1ff   :  { %850 = vxpose.xlu0.b32.start [1/2] (short) (narrow) %v2503_v57, 8 }
 0x203   :  { %851 = vxpose.xlu0.b32.end [2/2] (short) (narrow) %v2505_v58, 8  ;;  %v2550_v58 = vrot.slane %v1043_v52, %v2454_v11 }
 0x205   :  { %v1133_v63 = vrot.slane %v2550_v58, %v2458_v14 }
 0x23c   :  { %v925_v33 = vpop.permute.xlu0 %924 }
 0x23e   :  { %v930_v31 = vpop.permute.xlu1 %929 }
 0x240   :  { %v885_v35 = vpop.permute.xlu0 %884 }
 0x244   :  { %v935_v37 = vpop.permute.xlu0 %934 }
 0x248   :  { %v2520_v40 = vpop.permute.xlu0 %944 }
 0x24c   :  { %v890_v32 = vpop.permute.xlu1 %889 }
 0x250   :  { %v2511_v34 = vpop.permute.xlu1 %894  ;;  %v2524_v43 = vpop.permute.xlu0 %904 }
 0x254   :  { %v2513_v36 = vpop.permute.xlu1 %939 }
 0x258   :  { %v2536_v47 = vpop.permute.xlu0 %914 }
 0x25c   :  { %v2515_v38 = vpop.permute.xlu1 %899  ;;  %v2543_v54 = vpop.permute.xlu0 %954 }
 0x260   :  { %v2522_v41 = vpop.permute.xlu1 %909 }
 0x264   :  { %v2526_v44 = vpop.permute.xlu1 %919 }
 0x268   :  { %v950_v51 = vpop.permute.xlu1 %949 }
 0x26c   :  { %v960_v57 = vpop.permute.xlu1 %959 }
 0x27b   :  { %v2558_v62 = vpop.trf.xlu0 }
 0x27c   :  { %v977_v2 = vadd.f32 %v960_v57, %v2558_v62  ;;  %v962_v3 = vadd.f32 %v885_v35, %v2558_v62  ;;  %v963_v4 = vadd.f32 %v890_v32, %v2558_v62  ;;  %v970_v5 = vadd.f32 %v925_v33, %v2558_v62 }
 0x27d   :  { %v975_v6 = vadd.f32 %v950_v51, %v2558_v62  ;;  %v971_v8 = vadd.f32 %v930_v31, %v2558_v62  ;;  %v972_v9 = vadd.f32 %v935_v37, %v2558_v62  ;;  %v964_v31 = vadd.f32 %v2511_v34, %v2558_v62 }
 0x27e   :  { %vm993_vm2 = vcmp.gt.f32.partialorder %v977_v2, 0.0  ;;  %v1009_v12 = vmul.f32 0.2, %v977_v2  ;;  %vm978_vm3 = vcmp.gt.f32.partialorder %v962_v3, 0.0  ;;  %v994_v15 = vmul.f32 0.2, %v962_v3 }
 0x27f   :  { %vm979_vm4 = vcmp.gt.f32.partialorder %v963_v4, 0.0  ;;  %v995_v16 = vmul.f32 0.2, %v963_v4  ;;  %vm986_vm5 = vcmp.gt.f32.partialorder %v970_v5, 0.0  ;;  %v1002_v17 = vmul.f32 0.2, %v970_v5 }
 0x280   :  { %v1010_v18 = vsel %vm978_vm3, %v962_v3, %v994_v15  ;;  %vm991_vm6 = vcmp.gt.f32.partialorder %v975_v6, 0.0  ;;  %v1007_v19 = vmul.f32 0.2, %v975_v6  ;;  %vm987_vm7 = vcmp.gt.f32.partialorder %v971_v8, 0.0 }
 0x281   :  { %v2571_v20 = vadd.f32 %v1129_v60, %v1010_v18  ;;  %v1011_v21 = vsel %vm979_vm4, %v963_v4, %v995_v16  ;;  %v1018_v22 = vsel %vm986_vm5, %v970_v5, %v1002_v17  ;;  %v1003_v23 = vmul.f32 0.2, %v971_v8 }
 0x282   :  { %v2573_v24 = vadd.f32 %v1133_v63, %v1011_v21  ;;  %v1023_v25 = vsel %vm991_vm6, %v975_v6, %v1007_v19  ;;  %v2580_v29 = vadd.f32 %v1161_v0, %v1018_v22  ;;  %v1025_v37 = vsel %vm993_vm2, %v977_v2, %v1009_v12 }
 0x283   :  { %v1223_v28 = vsel %vm1222_vm1, %v2571_v20, -inf  ;;  %v2586_v33 = vadd.f32 %v1181_v7, %v1023_v25  ;;  %v1019_v35 = vsel %vm987_vm7, %v971_v8, %v1003_v23  ;;  %vm988_vm8 = vcmp.gt.f32.partialorder %v972_v9, 0.0 }
 0x284   :  { %1224 = vmax.xlane.f32.xlu1 %v1223_v28  ;;  %v1226_v32 = vsel %vm1222_vm1, %v2573_v24, -inf  ;;  %v1004_v39 = vmul.f32 0.2, %v972_v9  ;;  %v1247_v34 = vsel %vm1222_vm1, %v2580_v29, -inf  ;;  %v2596_v49 = vadd.f32 %v1165_v26, %v1019_v35 }
 0x285   :  { %1227 = vmax.xlane.f32.xlu0 %v1226_v32  ;;  %v2598_v50 = vadd.f32 %v1189_v27, %v1025_v37  ;;  %v1169_v51 = vrot.slane %v1122_v30, %v2458_v14  ;;  %v1262_v52 = vsel %vm1222_vm1, %v2586_v33, -inf  ;;  %v996_v55 = vmul.f32 0.2, %v964_v31 }
 0x286   :  { %v1020_v53 = vsel %vm988_vm8, %v972_v9, %v1004_v39  ;;  %v966_v56 = vadd.f32 %v2524_v43, %v2558_v62  ;;  %vm980_vm9 = vcmp.gt.f32.partialorder %v964_v31, 0.0  ;;  %v1250_v46 = vsel %vm1222_vm1, %v2596_v49, -inf }
 0x287   :  { %v2607_v57 = vadd.f32 %v1169_v51, %v1020_v53  ;;  %v1042_v60 = vrot.slane %v1028_v48, %v2454_v11  ;;  %v1268_v63 = vsel %vm1222_vm1, %v2598_v50, -inf  ;;  %v1012_v0 = vsel %vm980_vm9, %v964_v31, %v996_v55 }
 0x288   :  { %1248 = vmax.xlane.f32.xlu1 %v1247_v34  ;;  %v998_v1 = vmul.f32 0.2, %v966_v56  ;;  %v973_v43 = vadd.f32 %v2513_v36, %v2558_v62  ;;  %vm982_vm10 = vcmp.gt.f32.partialorder %v966_v56, 0.0  ;;  %v2618_v4 = vadd.f32 %v1137_v59, %v1012_v0 }
 0x289   :  { %1263 = vmax.xlane.f32.xlu0 %v1262_v52  ;;  %v1058_v2 = vrot.slane %v1042_v60, %v2454_v11  ;;  %v1253_v3 = vsel %vm1222_vm1, %v2607_v57, -inf  ;;  %v1124_v6 = vcombine.high %v2556_v61, %v2556_v61  ;;  %v965_v36 = vadd.f32 %v2515_v38, %v2558_v62 }
 0x28a   :  { %v1014_v7 = vsel %vm982_vm10, %v966_v56, %v998_v1  ;;  %v1005_v8 = vmul.f32 0.2, %v973_v43  ;;  %vm989_vm11 = vcmp.gt.f32.partialorder %v973_v43, 0.0  ;;  %v1229_v9 = vsel %vm1222_vm1, %v2618_v4, -inf }
 0x28b   :  { %v1145_v5 = vrot.slane %v1058_v2, %v2458_v14  ;;  %v1173_v15 = vrot.slane %v1124_v6, %v2458_v14  ;;  %v1075_v16 = vcombine.high %v2550_v58, %v2550_v58  ;;  %v997_v61 = vmul.f32 0.2, %v965_v36 }
 0x28c   :  { %1251 = vmax.xlane.f32.xlu1 %v1250_v46  ;;  %v1021_v17 = vsel %vm989_vm11, %v973_v43, %v1005_v8  ;;  %v967_v18 = vadd.f32 %v2522_v41, %v2558_v62  ;;  %vm981_vm12 = vcmp.gt.f32.partialorder %v965_v36, 0.0  ;;  %v1044_v19 = vcombine.high %v1042_v60, %v1042_v60 }
 0x28d   :  { %1269 = vmax.xlane.f32.xlu0 %v1268_v63  ;;  %v2627_v12 = vadd.f32 %v1145_v5, %v1014_v7  ;;  %v2636_v21 = vadd.f32 %v1173_v15, %v1021_v17  ;;  %v1141_v22 = vrot.slane %v1075_v16, %v2458_v14  ;;  %v1013_v23 = vsel %vm981_vm12, %v965_v36, %v997_v61 }
 0x28e   :  { %v999_v25 = vmul.f32 0.2, %v967_v18  ;;  %v968_v58 = vadd.f32 %v2536_v47, %v2558_v62  ;;  %vm983_vm13 = vcmp.gt.f32.partialorder %v967_v18, 0.0  ;;  %v1072_v26 = vrot.slane %v1044_v19, %v2454_v11 }
 0x28f   :  { %v1235_v38 = vsel %vm1222_vm1, %v2627_v12, -inf  ;;  %v1256_v41 = vsel %vm1222_vm1, %v2636_v21, -inf  ;;  %v2644_v27 = vadd.f32 %v1141_v22, %v1013_v23  ;;  %v1074_v30 = vcombine.high %v1058_v2, %v1058_v2 }
 0x290   :  { %1254 = vmax.xlane.f32.xlu1 %v1253_v3  ;;  %v1149_v28 = vrot.slane %v1072_v26, %v2458_v14  ;;  %v1015_v31 = vsel %vm983_vm13, %v967_v18, %v999_v25  ;;  %v1000_v32 = vmul.f32 0.2, %v968_v58  ;;  %v969_v35 = vadd.f32 %v2526_v44, %v2558_v62 }
 0x291   :  { %vm984_vm14 = vcmp.gt.f32.partialorder %v968_v58, 0.0  ;;  %v1232_v47 = vsel %vm1222_vm1, %v2644_v27, -inf  ;;  %v1153_v39 = vrot.slane %v1074_v30, %v2458_v14  ;;  %v1076_v42 = vcombine.high %v1072_v26, %v1072_v26 }
 0x292   :  { %v2651_v37 = vadd.f32 %v1149_v28, %v1015_v31  ;;  %v1016_v48 = vsel %vm984_vm14, %v968_v58, %v1000_v32  ;;  %v1001_v34 = vmul.f32 0.2, %v969_v35  ;;  %v974_v51 = vadd.f32 %v2520_v40, %v2558_v62 }
 0x293   :  { %vm985_vm15 = vcmp.gt.f32.partialorder %v969_v35, 0.0  ;;  %v2658_v44 = vadd.f32 %v1153_v39, %v1016_v48  ;;  %v1157_v53 = vrot.slane %v1076_v42, %v2458_v14  ;;  %v1107_v55 = vrot.slane %v2529_v45, %v2454_v11 }
 0x294   :  { %1230 = vmax.xlane.f32.xlu1 %v1229_v9  ;;  %v1238_v52 = vsel %vm1222_vm1, %v2651_v37, -inf  ;;  %v1017_v56 = vsel %vm985_vm15, %v969_v35, %v1001_v34  ;;  %v1006_v46 = vmul.f32 0.2, %v974_v51  ;;  %v976_v59 = vadd.f32 %v2543_v54, %v2558_v62 }
 0x295   :  { %vm990_vm0 = vcmp.gt.f32.partialorder %v974_v51, 0.0  ;;  %v1241_v40 = vsel %vm1222_vm1, %v2658_v44, -inf  ;;  %v2667_v60 = vadd.f32 %v1157_v53, %v1017_v56  ;;  %v1177_v63 = vrot.slane %v1107_v55, %v2458_v14 }
 0x296   :  { %v1123_v0 = vcombine.high %v1107_v55, %v1107_v55  ;;  %v1022_v1 = vsel %vm990_vm0, %v974_v51, %v1006_v46  ;;  %v1008_v43 = vmul.f32 0.2, %v976_v59  ;;  %vm992_vm2 = vcmp.gt.f32.partialorder %v976_v59, 0.0 }
 0x297   :  { %v1244_v11 = vsel %vm1222_vm1, %v2667_v60, -inf  ;;  %v2672_v45 = vadd.f32 %v1177_v63, %v1022_v1  ;;  %vm1586_vm3 = vcmask 519168   ;;  %vm1763_vm4 = vcmask 1041409  }
 0x298   :  { %1236 = vmax.xlane.f32.xlu1 %v1235_v38  ;;  %v1185_v54 = vrot.slane %v1123_v0, %v2458_v14  ;;  %v1024_v62 = vsel %vm992_vm2, %v976_v59, %v1008_v43  ;;  %vm1766_vm5 = vcmask 1042434   ;;  %vm1769_vm6 = vcmask 1043459  }
 0x299   :  { %v1259_v2 = vsel %vm1222_vm1, %v2672_v45, -inf  ;;  %vm1772_vm7 = vcmask 1044484   ;;  %vm1775_vm8 = vcmask 1045509   ;;  %vm1778_vm9 = vcmask 1046534  }
 0x29a   :  { %v2677_v3 = vadd.f32 %v1185_v54, %v1024_v62  ;;  %vm1781_vm10 = vcmask 1047559   ;;  %vm1797_vm11 = vcmask 523264   ;;  %vm2114_vm2 = vcmask 122880  }
 0x29c   :  { %1257 = vmax.xlane.f32.xlu1 %v1256_v41  ;;  %v1265_v5 = vsel %vm1222_vm1, %v2677_v3, -inf }
 0x2a0   :  { %1233 = vmax.xlane.f32.xlu1 %v1232_v47 }
 0x2a4   :  { %1239 = vmax.xlane.f32.xlu1 %v1238_v52 }
 0x2a8   :  { %1242 = vmax.xlane.f32.xlu1 %v1241_v40 }
 0x2ac   :  { %1245 = vmax.xlane.f32.xlu1 %v1244_v11 }
 0x2b0   :  { %1260 = vmax.xlane.f32.xlu1 %v1259_v2 }
 0x2b4   :  { %1266 = vmax.xlane.f32.xlu1 %v1265_v5 }
 0x30d   :  { %v1225_v6 = vpop.xlane.xlu1 %1224 }
 0x30e   :  { %v1271_v7 = vsub.f32 %v2571_v20, %v1225_v6  ;;  %v1228_v8 = vpop.xlane.xlu0 %1227 }
 0x30f   :  { %v1272_v16 = vsub.f32 %v2573_v24, %v1228_v8 }
 0x310   :  { %v1287_v15 = vmul.f32 1.442695, %v1271_v7 }
 0x311   :  { %v1249_v36 = vpop.xlane.xlu1 %1248  ;;  %v1289_v19 = vmul.f32 1.442695, %v1272_v16 }
 0x312   :  { %v1279_v9 = vsub.f32 %v2580_v29, %v1249_v36  ;;  %v1264_v56 = vpop.xlane.xlu0 %1263 }
 0x313   :  { %v1284_v0 = vsub.f32 %v2586_v33, %v1264_v56 }
 0x314   :  { %v1303_v17 = vmul.f32 1.442695, %v1279_v9 }
 0x315   :  { %v1252_v61 = vpop.xlane.xlu1 %1251  ;;  %v1313_v2 = vmul.f32 1.442695, %v1284_v0 }
 0x316   :  { %2258 = vpow2.f32 %v1303_v17  ;;  %v1280_v18 = vsub.f32 %v2596_v49, %v1252_v61  ;;  %v1270_v43 = vpop.xlane.xlu0 %1269 }
 0x317   :  { %2260 = vpow2.f32 %v1287_v15  ;;  %v1286_v5 = vsub.f32 %v2598_v50, %v1270_v43 }
 0x318   :  { %v1305_v38 = vmul.f32 1.442695, %v1280_v18 }
 0x319   :  { %v1255_v22 = vpop.xlane.xlu1 %1254  ;;  %v1317_v36 = vmul.f32 1.442695, %v1286_v5 }
 0x31a   :  { %2262 = vpow2.f32 %v1305_v38  ;;  %v1281_v23 = vsub.f32 %v2607_v57, %v1255_v22 }
 0x31b   :  { %2264 = vpow2.f32 %v1289_v19 }
 0x31c   :  { %v1307_v20 = vmul.f32 1.442695, %v1281_v23 }
 0x31d   :  { %v1231_v25 = vpop.xlane.xlu1 %1230 }
 0x31e   :  { %2266 = vpow2.f32 %v1307_v20  ;;  %v1273_v29 = vsub.f32 %v2618_v4, %v1231_v25 }
 0x320   :  { %v1291_v58 = vmul.f32 1.442695, %v1273_v29 }
 0x321   :  { %v1237_v24 = vpop.xlane.xlu1 %1236 }
 0x322   :  { %2268 = vpow2.f32 %v1291_v58  ;;  %v1275_v26 = vsub.f32 %v2627_v12, %v1237_v24 }
 0x323   :  { %v2688_v41 = vpop.eup %2258 }
 0x324   :  { %v1295_v49 = vmul.f32 1.442695, %v1275_v26  ;;  %v1343_v28 = vsel %vm1222_vm1, %v2688_v41, 0.0  ;;  %v2692_v30 = vpop.eup %2260 }
 0x325   :  { %v1258_v57 = vpop.xlane.xlu1 %1257  ;;  %1344 = vadd.xlane.f32.xlu1 %v1343_v28  ;;  %v1319_v12 = vsel %vm1222_vm1, %v2692_v30, 0.0 }
 0x326   :  { %2270 = vpow2.f32 %v1295_v49  ;;  %v1282_v31 = vsub.f32 %v2636_v21, %v1258_v57 }
 0x327   :  { %v2695_v32 = vpop.eup %2262 }
 0x328   :  { %v1309_v4 = vmul.f32 1.442695, %v1282_v31  ;;  %v1346_v35 = vsel %vm1222_vm1, %v2695_v32, 0.0  ;;  %v2701_v47 = vpop.eup %2264 }
 0x329   :  { %1347 = vadd.xlane.f32.xlu0 %v1346_v35  ;;  %v1234_v39 = vpop.xlane.xlu1 %1233  ;;  %1320 = vadd.xlane.f32.xlu1 %v1319_v12  ;;  %v1322_v34 = vsel %vm1222_vm1, %v2701_v47, 0.0 }
 0x32a   :  { %2272 = vpow2.f32 %v1309_v4  ;;  %v1274_v42 = vsub.f32 %v2644_v27, %v1234_v39 }
 0x32b   :  { %v2704_v48 = vpop.eup %2266 }
 0x32c   :  { %v1293_v21 = vmul.f32 1.442695, %v1274_v42  ;;  %v1349_v51 = vsel %vm1222_vm1, %v2704_v48, 0.0 }
 0x32d   :  { %1323 = vadd.xlane.f32.xlu0 %v1322_v34  ;;  %v1240_v52 = vpop.xlane.xlu1 %1239  ;;  %1350 = vadd.xlane.f32.xlu1 %v1349_v51 }
 0x32e   :  { %2274 = vpow2.f32 %v1293_v21  ;;  %v1276_v53 = vsub.f32 %v2651_v37, %v1240_v52 }
 0x32f   :  { %v2711_v55 = vpop.eup %2268 }
 0x330   :  { %v1297_v46 = vmul.f32 1.442695, %v1276_v53  ;;  %v1325_v27 = vsel %vm1222_vm1, %v2711_v55, 0.0 }
 0x331   :  { %v1243_v59 = vpop.xlane.xlu1 %1242  ;;  %1326 = vadd.xlane.f32.xlu1 %v1325_v27 }
 0x332   :  { %2276 = vpow2.f32 %v1297_v46  ;;  %v1277_v40 = vsub.f32 %v2658_v44, %v1243_v59 }
 0x333   :  { %v2716_v63 = vpop.eup %2270 }
 0x334   :  { %v1299_v1 = vmul.f32 1.442695, %v1277_v40  ;;  %v1331_v37 = vsel %vm1222_vm1, %v2716_v63, 0.0 }
 0x335   :  { %1332 = vadd.xlane.f32.xlu1 %v1331_v37  ;;  %v1246_v11 = vpop.xlane.xlu1 %1245 }
 0x336   :  { %2278 = vpow2.f32 %v1299_v1  ;;  %v1278_v54 = vsub.f32 %v2667_v60, %v1246_v11 }
 0x337   :  { %v2722_v62 = vpop.eup %2272 }
 0x338   :  { %v1301_v44 = vmul.f32 1.442695, %v1278_v54  ;;  %v1352_v6 = vsel %vm1222_vm1, %v2722_v62, 0.0 }
 0x339   :  { %1353 = vadd.xlane.f32.xlu0 %v1352_v6  ;;  %v1261_v33 = vpop.xlane.xlu1 %1260 }
 0x33a   :  { %2280 = vpow2.f32 %v1301_v44  ;;  %v1283_v7 = vsub.f32 %v2672_v45, %v1261_v33 }
 0x33b   :  { %v2728_v8 = vpop.eup %2274  ;;  %2282 = vpow2.f32 %v1313_v2 }
 0x33c   :  { %v1311_v9 = vmul.f32 1.442695, %v1283_v7  ;;  %v1328_v60 = vsel %vm1222_vm1, %v2728_v8, 0.0 }
 0x33d   :  { %1329 = vadd.xlane.f32.xlu0 %v1328_v60  ;;  %v1267_v15 = vpop.xlane.xlu1 %1266 }
 0x33e   :  { %2284 = vpow2.f32 %v1311_v9  ;;  %v1285_v50 = vsub.f32 %v2677_v3, %v1267_v15 }
 0x33f   :  { %v2733_v16 = vpop.eup %2276  ;;  %2286 = vpow2.f32 %v1317_v36 }
 0x340   :  { %v1315_v17 = vmul.f32 1.442695, %v1285_v50  ;;  %v1334_v45 = vsel %vm1222_vm1, %v2733_v16, 0.0 }
 0x341   :  { %1335 = vadd.xlane.f32.xlu0 %v1334_v45 }
 0x342   :  { %2288 = vpow2.f32 %v1315_v17 }
 0x343   :  { %v2737_v61 = vpop.eup %2278 }
 0x344   :  { %v1337_v18 = vsel %vm1222_vm1, %v2737_v61, 0.0 }
 0x345   :  { %1338 = vadd.xlane.f32.xlu1 %v1337_v18 }
 0x347   :  { %v2741_v19 = vpop.eup %2280 }
 0x348   :  { %v1340_v3 = vsel %vm1222_vm1, %v2741_v19, 0.0  ;;  %v2745_v38 = vpop.eup %2282 }
 0x349   :  { %1341 = vadd.xlane.f32.xlu0 %v1340_v3  ;;  %v1358_v23 = vsel %vm1222_vm1, %v2745_v38, 0.0 }
 0x34b   :  { %v2747_v22 = vpop.eup %2284 }
 0x34c   :  { %v1355_v20 = vsel %vm1222_vm1, %v2747_v22, 0.0  ;;  %v2753_v25 = vpop.eup %2286 }
 0x34d   :  { %1359 = vadd.xlane.f32.xlu0 %v1358_v23  ;;  %1356 = vadd.xlane.f32.xlu1 %v1355_v20  ;;  %v1364_v58 = vsel %vm1222_vm1, %v2753_v25, 0.0 }
 0x34f   :  { %v2755_v29 = vpop.eup %2288 }
 0x350   :  { %v1361_v24 = vsel %vm1222_vm1, %v2755_v29, 0.0  ;;  %vm1423_vm1 = vcmask 130048  }
 0x351   :  { %1365 = vadd.xlane.f32.xlu0 %v1364_v58  ;;  %1362 = vadd.xlane.f32.xlu1 %v1361_v24 }
 0x3ae   :  { %v1345_v26 = vpop.xlane.xlu1 %1344 }
 0x3b2   :  { %v1348_v49 = vpop.xlane.xlu0 %1347  ;;  %v1321_v28 = vpop.xlane.xlu1 %1320 }
 0x3b3   :  { %2290 = vrcp.f32 %v1321_v28  ;;  %v1738_v28 = vld [vmem:[%s2932_s3] sm:$0xff] }
 0x3b6   :  { %v1324_v57 = vpop.xlane.xlu0 %1323  ;;  %v1351_v31 = vpop.xlane.xlu1 %1350 }
 0x3b7   :  { %2292 = vrcp.f32 %v1324_v57  ;;  %v2812_v57 = vld [vmem:[%s2935_s6] sm:$0xf] }
 0x3ba   :  { %v1327_v4 = vpop.xlane.xlu1 %1326 }
 0x3bb   :  { %2294 = vrcp.f32 %v1327_v4 }
 0x3be   :  { %v1333_v34 = vpop.xlane.xlu1 %1332 }
 0x3c0   :  { %v2291_v35 = vpop.eup %2290 }
 0x3c1   :  { %v1383_v42 = vmul.f32 %v2291_v35, %v2692_v30 }
 0x3c2   :  { %v1354_v12 = vpop.xlane.xlu0 %1353 }
 0x3c4   :  { %v2293_v39 = vpop.eup %2292 }
 0x3c5   :  { %v1384_v21 = vmul.f32 %v2293_v39, %v2701_v47 }
 0x3c6   :  { %v1330_v51 = vpop.xlane.xlu0 %1329 }
 0x3c7   :  { %2296 = vrcp.f32 %v1330_v51  ;;  %v1415_v52 = vcombine.low %v1383_v42, %v1384_v21 }
 0x3c8   :  { %2298 = vrcp.f32 %v1333_v34  ;;  %v2295_v46 = vpop.eup %2294 }
 0x3c9   :  { %2205 = vmatprep.mubr.msk.f32.mxu1 %vm1423_vm1, %v1415_v52  ;;  %v1385_v47 = vmul.f32 %v2295_v46, %v2711_v55 }
 0x3ca   :  { %v1336_v53 = vpop.xlane.xlu0 %1335 }
 0x3cb   :  { %2300 = vrcp.f32 %v1336_v53 }
 0x3cc   :  { %2302 = vrcp.f32 %v1345_v26  ;;  %v1740_v26 = vld [vmem:[%s2932_s3 + $0x10] sm:$0xff] }
 0x3cd   :  { %2304 = vrcp.f32 %v1348_v49  ;;  %v1739_v49 = vld [vmem:[%s2932_s3 + $0x8] sm:$0xff] }
 0x3ce   :  { %v1339_v56 = vpop.xlane.xlu1 %1338 }
 0x3cf   :  { %2306 = vrcp.f32 %v1339_v56 }
 0x3d0   :  { %2308 = vrcp.f32 %v1354_v12 }
 0x3d2   :  { %v1342_v27 = vpop.xlane.xlu0 %1341 }
 0x3d3   :  { %2310 = vrcp.f32 %v1342_v27 }
 0x3d4   :  { %v2297_v30 = vpop.eup %2296  ;;  %2312 = vrcp.f32 %v1351_v31 }
 0x3d5   :  { %v1386_v59 = vmul.f32 %v2297_v30, %v2728_v8  ;;  %v2299_v40 = vpop.eup %2298 }
 0x3d6   :  { %v1360_v0 = vpop.xlane.xlu0 %1359  ;;  %v1357_v1 = vpop.xlane.xlu1 %1356  ;;  %v1387_v11 = vmul.f32 %v2299_v40, %v2716_v63 }
 0x3d7   :  { %2314 = vrcp.f32 %v1360_v0  ;;  %v1416_v37 = vcombine.low %v1385_v47, %v1386_v59 }
 0x3d8   :  { %v2301_v43 = vpop.eup %2300  ;;  %2316 = vrcp.f32 %v1357_v1 }
 0x3d9   :  { %2206 = vmatmul.mubr.msk.f32.vlgmr.msra.gmra.mxu1 %vm1423_vm1, %v1416_v37  ;;  %v1388_v54 = vmul.f32 %v2301_v43, %v2733_v16  ;;  %v2303_v55 = vpop.eup %2302 }
 0x3da   :  { %v1366_v2 = vpop.xlane.xlu0 %1365  ;;  %v1363_v5 = vpop.xlane.xlu1 %1362  ;;  %v1391_v15 = vmul.f32 %v2303_v55, %v2688_v41 }
 0x3db   :  { %2318 = vrcp.f32 %v1366_v2  ;;  %v1417_v44 = vcombine.low %v1387_v11, %v1388_v54  ;;  %v2305_v6 = vpop.eup %2304 }
 0x3dc   :  { %2320 = vrcp.f32 %v1363_v5  ;;  %v2307_v33 = vpop.eup %2306  ;;  %v1392_v36 = vmul.f32 %v2305_v6, %v2695_v32 }
 0x3dd   :  { %2208 = vmatprep.mubr.msk.f32.mxu1 %vm1423_vm1, %v1417_v44  ;;  %v2309_v7 = vpop.eup %2308  ;;  %v1389_v9 = vmul.f32 %v2307_v33, %v2737_v61 }
 0x3de   :  { %v1394_v16 = vmul.f32 %v2309_v7, %v2722_v62  ;;  %v1419_v45 = vcombine.low %v1391_v15, %v1392_v36  ;;  %v2826_v15 = vld [vmem:[%s2931_s2] ss:$0 sm:$0xff]  ;;  %s2385_s2 = smov 120  }
 0x3e0   :  { %v2311_v8 = vpop.eup %2310 }
 0x3e1   :  { %v1390_v63 = vmul.f32 %v2311_v8, %v2741_v19  ;;  %v2313_v60 = vpop.eup %2312 }
 0x3e2   :  { %v1393_v3 = vmul.f32 %v2313_v60, %v2704_v48  ;;  %v1745_v48 = vld [vmem:[%s2932_s3 + $0x38] sm:$0xff] }
 0x3e3   :  { %v1418_v50 = vcombine.low %v1389_v9, %v1390_v63  ;;  %2217 = vmatprep.subr.mxu1 %v1745_v48 }
 0x3e4   :  { %v2315_v17 = vpop.eup %2314  ;;  %v1420_v61 = vcombine.low %v1393_v3, %v1394_v16  ;;  %2218 = vmatpush3.msra.mxu1 %v1745_v48 }
 0x3e5   :  { %v2317_v18 = vpop.eup %2316  ;;  %2209 = vmatmul.mubr.msk.f32.gmra.mxu1 %vm1423_vm1, %v1418_v50  ;;  %v1396_v23 = vmul.f32 %v2315_v17, %v2745_v38  ;;  %v1744_v38 = vld [vmem:[%s2932_s3 + $0x30] sm:$0xff] }
 0x3e6   :  { %2211 = vmatprep.mubr.msk.f32.mxu1 %vm1423_vm1, %v1419_v45  ;;  %v1395_v32 = vmul.f32 %v2317_v18, %v2747_v22  ;;  %2219 = vmatprep.subr.mxu1 %v1744_v38  ;;  %v1743_v22 = vld [vmem:[%s2932_s3 + $0x28] sm:$0xff] }
 0x3e7   :  { %2220 = vmatpush3.msra.mxu1 %v1744_v38 }
 0x3e8   :  { %v2319_v19 = vpop.eup %2318  ;;  %v1421_v20 = vcombine.low %v1395_v32, %v1396_v23  ;;  %2221 = vmatprep.subr.mxu1 %v1743_v22 }
 0x3e9   :  { %v2321_v41 = vpop.eup %2320  ;;  %2212 = vmatmul.mubr.msk.f32.gmra.mxu1 %vm1423_vm1, %v1420_v61  ;;  %v1398_v62 = vmul.f32 %v2319_v19, %v2753_v25  ;;  %v1742_v25 = vld [vmem:[%s2932_s3 + $0x20] sm:$0xff] }
 0x3ea   :  { %2214 = vmatprep.mubr.msk.f32.mxu1 %vm1423_vm1, %v1421_v20  ;;  %v1397_v58 = vmul.f32 %v2321_v41, %v2755_v29  ;;  %2222 = vmatpush3.msra.mxu1 %v1743_v22  ;;  %v1741_v29 = vld [vmem:[%s2932_s3 + $0x18] sm:$0xff] }
 0x3eb   :  { %2223 = vmatprep.subr.mxu1 %v1742_v25 }
 0x3ec   :  { %v1422_v24 = vcombine.low %v1397_v58, %v1398_v62  ;;  %2224 = vmatpush3.msra.mxu1 %v1742_v25 }
 0x3ed   :  { %2225 = vmatprep.subr.mxu1 %v1741_v29 }
 0x3ee   :  { %2215 = vmatmul.mubr.msk.f32.gmra.mxu1 %vm1423_vm1, %v1422_v24 }
 0x3ef   :  { %2226 = vmatpush3.msra.mxu1 %v1741_v29 }
 0x3f0   :  { %2227 = vmatprep.subr.mxu1 %v1740_v26 }
 0x3f1   :  { %2228 = vmatpush3.msra.mxu1 %v1740_v26 }
 0x3f2   :  { %2229 = vmatprep.subr.mxu1 %v1739_v49 }
 0x3f3   :  { %2230 = vmatpush3.msra.mxu1 %v1739_v49 }
 0x3f4   :  { %2231 = vmatprep.subr.mxu1 %v1738_v28 }
 0x3f5   :  { %2232 = vmatpush3.msra.mxu1 %v1738_v28 }
 0x499   :  { %v2207_v31 = vpop.f32.mrf.mxu1 }
 0x49a   :  { %v1554_v4 = vcombine.high %v2207_v31, %v2207_v31  ;;  %v1572_v35 = vmul.f32 %v2207_v31, %v2812_v57 }
 0x49b   :  { %v1506_v12 = vpop.f32.mrf.mxu1 }
 0x49c   :  { %v1573_v39 = vmul.f32 %v2812_v57, %v1554_v4  ;;  %v1601_v42 = vsel %vm1586_vm3, %v1572_v35, 0.0  ;;  %v1553_v21 = vcombine.high %v1506_v12, %v1506_v12  ;;  %v1570_v34 = vmul.f32 %v2812_v57, %v1506_v12 }
 0x49d   :  { %v1602_v51 = vrot.slane %v1601_v42, 4 }
 0x49e   :  { %v1608_v52 = vsel %vm1586_vm3, %v1573_v39, 0.0  ;;  %v1571_v53 = vmul.f32 %v2812_v57, %v1553_v21  ;;  %v1587_v56 = vsel %vm1586_vm3, %v1570_v34, 0.0 }
 0x49f   :  { %v1603_v46 = vadd.f32 %v1602_v51, %v1601_v42  ;;  %v1609_v27 = vrot.slane %v1608_v52, 4  ;;  %v1588_v30 = vrot.slane %v1587_v56, 4 }
 0x4a0   :  { %v1594_v47 = vsel %vm1586_vm3, %v1571_v53, 0.0 }
 0x4a1   :  { %v1604_v59 = vrot.slane %v1603_v46, 2  ;;  %v1610_v40 = vadd.f32 %v1609_v27, %v1608_v52  ;;  %v1589_v0 = vadd.f32 %v1588_v30, %v1587_v56  ;;  %v1595_v1 = vrot.slane %v1594_v47, 4 }
 0x4a3   :  { %v1605_v37 = vadd.f32 %v1604_v59, %v1603_v46  ;;  %v1611_v43 = vrot.slane %v1610_v40, 2  ;;  %v1590_v11 = vrot.slane %v1589_v0, 2  ;;  %v1596_v54 = vadd.f32 %v1595_v1, %v1594_v47 }
 0x4a5   :  { %v1606_v2 = vrot.slane %v1605_v37, 1  ;;  %v1612_v5 = vadd.f32 %v1611_v43, %v1610_v40  ;;  %v1591_v44 = vadd.f32 %v1590_v11, %v1589_v0  ;;  %v1597_v55 = vrot.slane %v1596_v54, 2  ;;  %v2210_v6 = vpop.f32.mrf.mxu1 }
 0x4a6   :  { %v1556_v33 = vcombine.high %v2210_v6, %v2210_v6  ;;  %v1576_v7 = vmul.f32 %v2210_v6, %v2812_v57 }
 0x4a7   :  { %v1607_v8 = vadd.f32 %v1606_v2, %v1605_v37  ;;  %v1613_v36 = vrot.slane %v1612_v5, 1  ;;  %v1592_v9 = vrot.slane %v1591_v44, 1  ;;  %v1598_v63 = vadd.f32 %v1597_v55, %v1596_v54  ;;  %v1516_v60 = vpop.f32.mrf.mxu1 }
 0x4a8   :  { %v1577_v50 = vmul.f32 %v2812_v57, %v1556_v33  ;;  %v1629_v16 = vsel %vm1586_vm3, %v1576_v7, 0.0  ;;  %v1555_v17 = vcombine.high %v1516_v60, %v1516_v60  ;;  %v1574_v45 = vmul.f32 %v2812_v57, %v1516_v60 }
 0x4a9   :  { %v1614_v18 = vadd.f32 %v1613_v36, %v1612_v5  ;;  %v1599_v3 = vrot.slane %v1598_v63, 1  ;;  %v1630_v23 = vrot.slane %v1629_v16, 4  ;;  %v2213_v20 = vpop.f32.mrf.mxu1  ;;  %v1708_v41 = vadd.f32 %v2826_v15, %v1607_v8 }
 0x4aa   :  { %v1636_v32 = vsel %vm1586_vm3, %v1577_v50, 0.0  ;;  %v1575_v61 = vmul.f32 %v2812_v57, %v1555_v17  ;;  %v1615_v19 = vsel %vm1586_vm3, %v1574_v45, 0.0  ;;  %v1593_v62 = vadd.f32 %v1592_v9, %v1591_v44 }
 0x4ab   :  { %v1600_v58 = vadd.f32 %v1599_v3, %v1598_v63  ;;  %v1631_v24 = vadd.f32 %v1630_v23, %v1629_v16  ;;  %v1637_v48 = vrot.slane %v1636_v32, 4  ;;  %v1616_v38 = vrot.slane %v1615_v19, 4  ;;  %v1526_v4 = vpop.f32.mrf.mxu1 }
 0x4ac   :  { %v1622_v22 = vsel %vm1586_vm3, %v1575_v61, 0.0  ;;  %v1709_v25 = vadd.f32 %v2826_v15, %v1614_v18  ;;  %v1724_v35 = vmax.f32 %v1708_v41, 0.0  ;;  %v2839_v12 = vadd.f32 %v2826_v15, %v1593_v62 }
 0x4ad   :  { %v1707_v29 = vadd.f32 %v2826_v15, %v1600_v58  ;;  %v1632_v26 = vrot.slane %v1631_v24, 2  ;;  %v1638_v49 = vadd.f32 %v1637_v48, %v1636_v32  ;;  %v1617_v28 = vadd.f32 %v1616_v38, %v1615_v19 }
 0x4ae   :  { %v1623_v31 = vrot.slane %v1622_v22, 4  ;;  %v1558_v39 = vcombine.high %v2213_v20, %v2213_v20  ;;  %v1580_v42 = vmul.f32 %v2213_v20, %v2812_v57  ;;  %v1725_v53 = vmax.f32 %v1709_v25, 0.0  ;;  %v2216_v33 = vpop.f32.mrf.mxu1 }
 0x4af   :  { %v1633_v21 = vadd.f32 %v1632_v26, %v1631_v24  ;;  %v1639_v34 = vrot.slane %v1638_v49, 2  ;;  %v1618_v51 = vrot.slane %v1617_v28, 2  ;;  %v1557_v27 = vcombine.high %v1526_v4, %v1526_v4 }
 0x4b0   :  { %v1624_v52 = vadd.f32 %v1623_v31, %v1622_v22  ;;  %v1581_v56 = vmul.f32 %v2812_v57, %v1558_v39  ;;  %v1657_v46 = vsel %vm1586_vm3, %v1580_v42, 0.0  ;;  %v1723_v30 = vmax.f32 %v1707_v29, 0.0  ;;  %v1536_v25 = vpop.f32.mrf.mxu1 }
 0x4b1   :  { %v1640_v47 = vadd.f32 %v1639_v34, %v1638_v49  ;;  %v1619_v59 = vadd.f32 %v1618_v51, %v1617_v28  ;;  %v1658_v0 = vrot.slane %v1657_v46, 4  ;;  %v1578_v37 = vmul.f32 %v2812_v57, %v1526_v4 }
 0x4b2   :  { %v1625_v40 = vrot.slane %v1624_v52, 2  ;;  %v1664_v1 = vsel %vm1586_vm3, %v1581_v56, 0.0  ;;  %v2846_v43 = vrot.slane %v1724_v35, 6  ;;  %v1722_v11 = vmax.f32 %v2839_v12, 0.0 }
 0x4b3   :  { %v1634_v54 = vrot.slane %v1633_v21, 1  ;;  %v1620_v2 = vrot.slane %v1619_v59, 1  ;;  %v1659_v5 = vadd.f32 %v1658_v0, %v1657_v46  ;;  %v1665_v44 = vrot.slane %v1664_v1, 4 }
 0x4b4   :  { %v1579_v55 = vmul.f32 %v2812_v57, %v1557_v27  ;;  %v1643_v6 = vsel %vm1586_vm3, %v1578_v37, 0.0  ;;  %v2851_v7 = vrot.slane %v1725_v53, 5  ;;  %v2853_v8 = vrot.slane %v1723_v30, 7 }
 0x4b5   :  { %v1641_v36 = vrot.slane %v1640_v47, 1  ;;  %v1626_v9 = vadd.f32 %v1625_v40, %v1624_v52  ;;  %v1660_v63 = vrot.slane %v1659_v5, 2  ;;  %v1666_v60 = vadd.f32 %v1665_v44, %v1664_v1 }
 0x4b6   :  { %v1644_v50 = vrot.slane %v1643_v6, 4  ;;  %v1650_v16 = vsel %vm1586_vm3, %v1579_v55, 0.0  ;;  %v1635_v17 = vadd.f32 %v1634_v54, %v1633_v21  ;;  %v1621_v45 = vadd.f32 %v1620_v2, %v1619_v59 }
 0x4b7   :  { %v1651_v18 = vrot.slane %v1650_v16, 4  ;;  %v1560_v3 = vcombine.high %v2216_v33, %v2216_v33  ;;  %v1661_v23 = vadd.f32 %v1660_v63, %v1659_v5  ;;  %v1667_v32 = vrot.slane %v1666_v60, 2 }
 0x4b8   :  { %v1645_v61 = vadd.f32 %v1644_v50, %v1643_v6  ;;  %v1584_v19 = vmul.f32 %v2216_v33, %v2812_v57  ;;  %v1642_v20 = vadd.f32 %v1641_v36, %v1640_v47  ;;  %v1627_v41 = vrot.slane %v1626_v9, 1 }
 0x4b9   :  { %v1652_v62 = vadd.f32 %v1651_v18, %v1650_v16  ;;  %v1585_v58 = vmul.f32 %v2812_v57, %v1560_v3  ;;  %v1662_v24 = vrot.slane %v1661_v23, 1  ;;  %v1668_v48 = vadd.f32 %v1667_v32, %v1666_v60 }
 0x4ba   :  { %v1646_v38 = vrot.slane %v1645_v61, 2  ;;  %v1685_v22 = vsel %vm1586_vm3, %v1584_v19, 0.0  ;;  %v2860_v29 = vadd.f32 %v2826_v15, %v1635_v17  ;;  %v1710_v31 = vadd.f32 %v2826_v15, %v1621_v45 }
 0x4bb   :  { %v1653_v26 = vrot.slane %v1652_v62, 2  ;;  %v1686_v49 = vrot.slane %v1685_v22, 4  ;;  %v1692_v28 = vsel %vm1586_vm3, %v1585_v58, 0.0  ;;  %v1669_v4 = vrot.slane %v1668_v48, 1 }
 0x4bc   :  { %v1647_v35 = vadd.f32 %v1646_v38, %v1645_v61  ;;  %v1693_v39 = vrot.slane %v1692_v28, 4  ;;  %v1559_v34 = vcombine.high %v1536_v25, %v1536_v25  ;;  %v1582_v51 = vmul.f32 %v2812_v57, %v1536_v25 }
 0x4bd   :  { %v1654_v42 = vadd.f32 %v1653_v26, %v1652_v62  ;;  %v1687_v21 = vadd.f32 %v1686_v49, %v1685_v22  ;;  %v1628_v52 = vadd.f32 %v1627_v41, %v1626_v9  ;;  %v1663_v53 = vadd.f32 %v1662_v24, %v1661_v23 }
 0x4be   :  { %v1648_v56 = vrot.slane %v1647_v35, 1  ;;  %v1694_v46 = vadd.f32 %v1693_v39, %v1692_v28  ;;  %v1583_v47 = vmul.f32 %v2812_v57, %v1559_v34  ;;  %v1671_v59 = vsel %vm1586_vm3, %v1582_v51, 0.0 }
 0x4bf   :  { %v1655_v27 = vrot.slane %v1654_v42, 1  ;;  %v1688_v30 = vrot.slane %v1687_v21, 2  ;;  %v1726_v40 = vmax.f32 %v1710_v31, 0.0  ;;  %v1670_v0 = vadd.f32 %v1669_v4, %v1668_v48 }
 0x4c0   :  { %v1649_v1 = vadd.f32 %v1648_v56, %v1647_v35  ;;  %v1695_v37 = vrot.slane %v1694_v46, 2  ;;  %v1672_v5 = vrot.slane %v1671_v59, 4  ;;  %v1678_v44 = vsel %vm1586_vm3, %v1583_v47, 0.0 }
 0x4c1   :  { %v1656_v54 = vadd.f32 %v1655_v27, %v1654_v42  ;;  %v1689_v2 = vadd.f32 %v1688_v30, %v1687_v21  ;;  %v1711_v55 = vadd.f32 %v2826_v15, %v1628_v52  ;;  %v1716_v6 = vadd.f32 %v2826_v15, %v1663_v53 }
 0x4c2   :  { %v1714_v57 = vadd.f32 %v2826_v15, %v1649_v1  ;;  %v1696_v33 = vadd.f32 %v1695_v37, %v1694_v46  ;;  %v1673_v63 = vadd.f32 %v1672_v5, %v1671_v59  ;;  %v1679_v60 = vrot.slane %v1678_v44, 4 }
 0x4c3   :  { %v1715_v36 = vadd.f32 %v2826_v15, %v1656_v54  ;;  %v1690_v9 = vrot.slane %v1689_v2, 1  ;;  %v1764_v50 = vsel %vm1763_vm4, %v2853_v8, %v1722_v11  ;;  %v1771_v16 = vrot.slane %v1726_v40, 4 }
 0x4c4   :  { %v1697_v17 = vrot.slane %v1696_v33, 1  ;;  %v1713_v45 = vadd.f32 %v2826_v15, %v1642_v20  ;;  %v1717_v18 = vadd.f32 %v2826_v15, %v1670_v0  ;;  %v1674_v23 = vrot.slane %v1673_v63, 2 }
 0x4c5   :  { %v1731_v3 = vmax.f32 %v1715_v36, 0.0  ;;  %v1680_v32 = vadd.f32 %v1679_v60, %v1678_v44  ;;  %v1732_v61 = vmax.f32 %v1716_v6, 0.0  ;;  %v1730_v19 = vmax.f32 %v1714_v57, 0.0 }
 0x4c6   :  { %v1691_v41 = vadd.f32 %v1690_v9, %v1689_v2  ;;  %v1727_v62 = vmax.f32 %v1711_v55, 0.0  ;;  %v1675_v24 = vadd.f32 %v1674_v23, %v1673_v63  ;;  %v1728_v12 = vmax.f32 %v2860_v29, 0.0 }
 0x4c7   :  { %v1783_v58 = vrot.slane %v1731_v3, 7  ;;  %v1681_v48 = vrot.slane %v1680_v32, 2  ;;  %v1698_v38 = vadd.f32 %v1697_v17, %v1696_v33  ;;  %v1729_v11 = vmax.f32 %v1713_v45, 0.0 }
 0x4c8   :  { %v1767_v8 = vsel %vm1766_vm5, %v2846_v43, %v1764_v50  ;;  %v1774_v20 = vrot.slane %v1727_v62, 3  ;;  %v1676_v22 = vrot.slane %v1675_v24, 1  ;;  %v1733_v26 = vmax.f32 %v1717_v18, 0.0 }
 0x4c9   :  { %v1682_v25 = vadd.f32 %v1681_v48, %v1680_v32  ;;  %v1785_v49 = vrot.slane %v1732_v61, 6  ;;  %v1784_v28 = vsel %vm1763_vm4, %v1783_v58, %v1730_v19  ;;  %v1770_v31 = vsel %vm1769_vm6, %v2851_v7, %v1767_v8  ;;  %v2335_v19 = vld [vmem:[%s2934_s5 + $0x8] sm:$0xff] }
 0x4ca   :  { %v1677_v4 = vadd.f32 %v1676_v22, %v1675_v24  ;;  %v1773_v29 = vsel %vm1772_vm7, %v1771_v16, %v1770_v31  ;;  %v1777_v39 = vrot.slane %v1728_v12, 2  ;;  %v1720_v42 = vadd.f32 %v2826_v15, %v1691_v41 }
 0x4cb   :  { %v1683_v35 = vrot.slane %v1682_v25, 1  ;;  %v1721_v43 = vadd.f32 %v2826_v15, %v1698_v38  ;;  %v1776_v21 = vsel %vm1775_vm8, %v1774_v20, %v1773_v29  ;;  %v1780_v34 = vrot.slane %v1729_v11, 1 }
 0x4cc   :  { %v1718_v52 = vadd.f32 %v2826_v15, %v1677_v4  ;;  %v1779_v53 = vsel %vm1778_vm9, %v1777_v39, %v1776_v21  ;;  %v1786_v56 = vsel %vm1766_vm5, %v1785_v49, %v1784_v28  ;;  %v1787_v7 = vrot.slane %v1733_v26, 5  ;;  %v2074_v26 = vld [vmem:[%s2933_s4] sm:$0xff]  ;;  %s2386_s4 = smov [#allocation4]  }
 0x4cd   :  { %v1684_v51 = vadd.f32 %v1683_v35, %v1682_v25  ;;  %v1782_v46 = vsel %vm1781_vm10, %v1780_v34, %v1779_v53  ;;  %v1736_v47 = vmax.f32 %v1720_v42, 0.0  ;;  %v1737_v1 = vmax.f32 %v1721_v43, 0.0  ;;  %s2133_s20 = sshll.u32 %s2386_s4, 4  ;;  %s2134_s20 = int_to_ptr.vmem [resolvable:$true] %s2133_s20 }
 0x4ce   :  { %v1734_v30 = vmax.f32 %v1718_v52, 0.0  ;;  %2233 = vmatprep.mubr.msk.f32.mxu1 %vm1797_vm11, %v1782_v46  ;;  %v1788_v59 = vsel %vm1769_vm6, %v1787_v7, %v1786_v56  ;;  %v2384_v6 = vmov 9   ;;  %s2336_s21 = scalar_lea.vmem %s2134_s20, 16  ;;  %s2340_s22 = scalar_lea.vmem %s2134_s20, 32 }
 0x4cf   :  { %v1719_v27 = vadd.f32 %v2826_v15, %v1684_v51  ;;  %v1793_v2 = vrot.slane %v1736_v47, 2  ;;  %v1795_v44 = vrot.slane %v1737_v1, 1  ;;  %2254 = vset.pattern.permute.xlu1 %v2384_v6  ;;  %p2337_p0 = scmp.ne.s32.totalorder %s2134_s20, %s2336_s21  ;;  %p2341_p1 = scmp.lt.s32.totalorder %s2134_s20, %s2134_s20 }
 0x4d0   :  { %v1789_v0 = vrot.slane %v1734_v30, 4  ;;  %p2342_p2 = scmp.lt.s32.totalorder %s2340_s22, %s2336_s21 }
 0x4d1   :  { %v1735_v40 = vmax.f32 %v1719_v27, 0.0 }
 0x4d2   :  { %v1790_v54 = vsel %vm1772_vm7, %v1789_v0, %v1788_v59  ;;  %p2343_p3 = por %p2342_p2, %p2341_p1 }
 0x4d3   :  { %v1791_v37 = vrot.slane %v1735_v40, 3 }
 0x4d4   :  { %p2344_p4 = pnand %p2343_p3, %p2337_p0 }
 0x4d5   :  { %v1792_v5 = vsel %vm1775_vm8, %v1791_v37, %v1790_v54 }
 0x4d6   :  { %v1794_v55 = vsel %vm1778_vm9, %v1793_v2, %v1792_v5 }
 0x4d7   :  { %v1796_v15 = vsel %vm1781_vm10, %v1795_v44, %v1794_v55 }
 0x4d8   :  { %2234 = vmatmul.mubr.msk.f32.vlgmr.msra.gmra.mxu1 %vm1797_vm11, %v1796_v15 }
 0x598   :  { %v2235_v57 = vpop.f32.mrf.mxu1 }
 0x599   :  { %1881 = vrot.lane.b32.xlu0 %v2235_v57, %s2385_s2  ;;  %2236 = vmatprep.subr.mxu0 %v2235_v57 }
 0x59a   :  { %v1868_v33 = vpop.f32.mrf.mxu1  ;;  %2237 = vmatpush3.msra.mxu0 %v2235_v57 }
 0x59b   :  { %1879 = vrot.lane.b32.xlu1 %v1868_v33, %s2385_s2  ;;  %2238 = vmatprep.subr.mxu0 %v1868_v33 }
 0x59c   :  { %2239 = vmatpush3.msra.mxu0 %v1868_v33 }
 0x59f   :  { %1918 = vperm.xlu1 %2254, %v1868_v33  }
 0x5a3   :  { %1922 = vperm.xlu1 %2254, %v2235_v57  }
 0x5a7   :  { %2255 = vset.pattern.permute.xlu1 %v2383_v13  ;;  %v2334_v13 = vld [vmem:[%s2934_s5] sm:$0xff] }
 0x60b   :  { %v1882_v9 = vpop.permute.xlu0 %1881 }
 0x60d   :  { %v1880_v36 = vpop.permute.xlu1 %1879 }
 0x60e   :  { %1885 = vxpose.xlu0.b32.start [1/2] (short) (narrow) %v1880_v36, 8 }
 0x612   :  { %1886 = vxpose.xlu0.b32.end [2/2] (short) (narrow) %v1882_v9, 8 }
 0x61a   :  { %v1919_v63 = vpop.permute.xlu1 %1918 }
 0x61e   :  { %v1923_v16 = vpop.permute.xlu1 %1922 }
 0x68a   :  { %v1901_v60 = vpop.trf.xlu0 }
 0x68b   :  { %v1928_v50 = vrot.slane %v1901_v60, %v2458_v14 }
 0x68d   :  { %v1929_v17 = vadd.f32 %v1928_v50, %v1919_v63  ;;  %v1930_v45 = vadd.f32 %v1928_v50, %v1923_v16 }
 0x68f   :  { %v1933_v18 = vmul.f32 0.2, %v1929_v17  ;;  %v1934_v3 = vmul.f32 0.2, %v1930_v45  ;;  %vm1931_vm12 = vcmp.gt.f32.partialorder %v1929_v17, 0.0  ;;  %vm1932_vm13 = vcmp.gt.f32.partialorder %v1930_v45, 0.0 }
 0x691   :  { %v1935_v23 = vsel %vm1931_vm12, %v1929_v17, %v1933_v18  ;;  %v1936_v32 = vsel %vm1932_vm13, %v1930_v45, %v1934_v3 }
 0x692   :  { %v1937_v61 = vadd.f32 %v2334_v13, %v1935_v23  ;;  %v1938_v41 = vadd.f32 %v2335_v19, %v1936_v32 }
 0x694   :  { %v1939_v14 = vsel %vm1423_vm1, %v1937_v61, -inf  ;;  %v1942_v62 = vsel %vm1423_vm1, %v1938_v41, -inf }
 0x695   :  { %1940 = vmax.xlane.f32.xlu1 %v1939_v14  ;;  %1943 = vmax.xlane.f32.xlu0 %v1942_v62 }
 0x71e   :  { %v1944_v58 = vpop.xlane.xlu0 %1943  ;;  %v1941_v24 = vpop.xlane.xlu1 %1940 }
 0x71f   :  { %v1946_v48 = vsub.f32 %v1938_v41, %v1944_v58  ;;  %v1945_v12 = vsub.f32 %v1937_v61, %v1941_v24 }
 0x721   :  { %v1947_v38 = vmul.f32 1.442695, %v1945_v12  ;;  %v1949_v11 = vmul.f32 1.442695, %v1946_v48 }
 0x723   :  { %2322 = vpow2.f32 %v1947_v38 }
 0x724   :  { %2324 = vpow2.f32 %v1949_v11 }
 0x730   :  { %v2323_v8 = vpop.eup %2322 }
 0x731   :  { %v1951_v20 = vsel %vm1423_vm1, %v2323_v8, 0.0  ;;  %v2325_v22 = vpop.eup %2324 }
 0x732   :  { %1952 = vadd.xlane.f32.xlu1 %v1951_v20  ;;  %v1954_v25 = vsel %vm1423_vm1, %v2325_v22, 0.0 }
 0x736   :  { %1955 = vadd.xlane.f32.xlu1 %v1954_v25 }
 0x747   :  { %2077 = vperm.xlu1 %2255, %v2074_v26  }
 0x7bb   :  { %v1953_v49 = vpop.xlane.xlu1 %1952 }
 0x7bc   :  { %2326 = vrcp.f32 %v1953_v49 }
 0x7bf   :  { %v1956_v28 = vpop.xlane.xlu1 %1955 }
 0x7c0   :  { %2328 = vrcp.f32 %v1956_v28 }
 0x7c3   :  { %v2078_v43 = vpop.permute.xlu1 %2077 }
 0x7c9   :  { %v2327_v31 = vpop.eup %2326 }
 0x7ca   :  { %v1959_v4 = vmul.f32 %v2327_v31, %v2323_v8 }
 0x7cc   :  { %2240 = vmatprep.mubr.msk.f32.mxu0 %vm1423_vm1, %v1959_v4 }
 0x7cd   :  { %v2329_v35 = vpop.eup %2328 }
 0x7ce   :  { %v1960_v29 = vmul.f32 %v2329_v35, %v2325_v22 }
 0x7d0   :  { %2241 = vmatmul.mubr.msk.f32.vlgmr.msra.gmra.mxu0 %vm1423_vm1, %v1960_v29 }
 0x890   :  { %v2242_v39 = vpop.f32.mrf.mxu0 }
 0x892   :  { %v2033_v42 = vpop.f32.mrf.mxu0 }
 0x893   :  { %2042 = vxpose.xlu1.b32.start [1/2] (short) (narrow) %v2033_v42, 8 }
 0x897   :  { %2043 = vxpose.xlu1.b32.end [2/2] (short) (narrow) %v2242_v39, 8 }
 0x90f   :  { %v2058_v21 = vpop.trf.xlu1 }
 0x910   :  { %v2080_v34 = vadd.f32 %v2078_v43, %v2058_v21 }
 0x912   :  { %v2081_v51 = vsel %vm1423_vm1, %v2080_v34, -inf }
 0x913   :  { %v2082_v52 = vrot.slane %v2081_v51, 4 }
 0x915   :  { %v2083_v53 = vmax.f32 %v2081_v51, %v2082_v52 }
 0x917   :  { %v2084_v56 = vrot.slane %v2083_v53, 2 }
 0x919   :  { %v2085_v7 = vmax.f32 %v2083_v53, %v2084_v56 }
 0x91b   :  { %v2086_v46 = vrot.slane %v2085_v7, 1 }
 0x91d   :  { %v2087_v27 = vmax.f32 %v2085_v7, %v2086_v46 }
 0x91f   :  { %v2088_v30 = vsub.f32 %v2080_v34, %v2087_v27  ;;  %vm2102_vm14 = vcmp.eq.f32.partialorder %v2080_v34, %v2087_v27 }
 0x920   :  { %v2103_v47 = vsel %vm2102_vm14, %v2451_v10, 1073741824 }
 0x921   :  { %v2089_v59 = vmul.f32 1.442695, %v2088_v30  ;;  %v2104_v40 = vsel %vm1423_vm1, %v2103_v47, 2147483647 }
 0x922   :  { %v2105_v0 = vrot.slane %v2104_v40, 4 }
 0x923   :  { %2330 = vpow2.f32 %v2089_v59 }
 0x924   :  { %vm2106_vm15 = vcmp.lt.s32.totalorder %v2104_v40, %v2105_v0 }
 0x925   :  { %v2107_v1 = vsel %vm2106_vm15, %v2104_v40, %v2105_v0 }
 0x926   :  { %v2108_v37 = vrot.slane %v2107_v1, 2 }
 0x928   :  { %vm2109_vm0 = vcmp.lt.s32.totalorder %v2107_v1, %v2108_v37 }
 0x929   :  { %v2110_v54 = vsel %vm2109_vm0, %v2107_v1, %v2108_v37 }
 0x92a   :  { %v2111_v2 = vrot.slane %v2110_v54, 1 }
 0x92c   :  { %vm2112_vm3 = vcmp.lt.s32.totalorder %v2110_v54, %v2111_v2 }
 0x92d   :  { %v2113_v5 = vsel %vm2112_vm3, %v2110_v54, %v2111_v2 }
 0x92e   :  { %2116 = vst.msk [vmem:[#allocation4] sm:$0x1] %vm2114_vm2, %v2113_v5 }
 0x92f   :  { %2347 = shalt.err (!%p2344_p4)
}
 0x930   :  { %2136 = dma.vmem_to_hbm [thread:$0]  %s2134_s20, 16, %s2937_s8, [#allocation5]   ;;  %v2331_v10 = vpop.eup %2330 }
 0x931   :  { %v2091_v44 = vsel %vm1423_vm1, %v2331_v10, 0.0  ;;  %s2387_s25 = smov [#allocation2]  }
 0x932   :  { %v2092_v55 = vrot.slane %v2091_v44, 4  ;;  %s2123_s26 = sshll.u32 %s2387_s25, 4  ;;  %s2124_s26 = int_to_ptr.vmem [resolvable:$true] %s2123_s26 }
 0x933   :  { %s2356_s27 = scalar_lea.vmem %s2124_s26, 16  ;;  %s2360_s28 = scalar_lea.vmem %s2124_s26, 32 }
 0x934   :  { %v2093_v15 = vadd.f32 %v2092_v55, %v2091_v44  ;;  %p2357_p5 = scmp.ne.s32.totalorder %s2124_s26, %s2356_s27  ;;  %p2361_p6 = scmp.lt.s32.totalorder %s2124_s26, %s2124_s26 }
 0x935   :  { %p2362_p7 = scmp.lt.s32.totalorder %s2360_s28, %s2356_s27 }
 0x936   :  { %v2094_v6 = vrot.slane %v2093_v15, 2 }
 0x937   :  { %p2363_p8 = por %p2362_p7, %p2361_p6 }
 0x938   :  { %v2095_v57 = vadd.f32 %v2094_v6, %v2093_v15 }
 0x939   :  { %p2364_p9 = pnand %p2363_p8, %p2357_p5 }
 0x93a   :  { %v2096_v33 = vrot.slane %v2095_v57, 1 }
 0x93c   :  { %v2097_v36 = vadd.f32 %v2096_v33, %v2095_v57 }
 0x93e   :  { %2332 = vrcp.f32 %v2097_v36 }
 0x94b   :  { %v2333_v9 = vpop.eup %2332 }
 0x94c   :  { %2115 = vst.msk [vmem:[#allocation2] sm:$0x1] %vm2114_vm2, %v2333_v9 }
 0x94d   :  { %2367 = shalt.err (!%p2364_p9)
}
 0x94e   :  { %2126 = dma.vmem_to_hbm [thread:$0]  %s2124_s26, 16, %s2936_s7, [#allocation3]  }
 0x94f   :  { %2376 = dma.done.wait [#allocation3], 16  }
 0x950   :  { %2377 = vsyncadd [#allocation3], 4294967280 }
 0x951   :  { %2378 = dma.done.wait [#allocation5], 16  }
 0x952   :  { %2379 = vsyncadd [#allocation5], 4294967280 }
 0x953   :  { %2143 = vsyncpa [#allocation3], 1 }
 0x954   :  { %2144 = vsyncpa [#allocation5], 1 }

</bundles_post_ra>
